<compile_context>
chip_gen: v7x
topology: tpu7x:2x2x1
jax: 0.10.0
libtpu: 0.0.40
codegen_flags: <defaults>
</compile_context>

<pallas_src>
import functools

import jax
import jax.numpy as jnp
from jax.experimental import pallas as pl
from jax.experimental.pallas import tpu as pltpu


# ----------------------------------------------------------------------------
# Fused kernel: FFN sublayer + residual + BatchNorm1d(eval) + optional pos
# ----------------------------------------------------------------------------
def _res_bn_pos_ffn_kernel(x_ref, w1_ref, b1_ref, w2_ref,
                           scale_ref, shift_ref, *rest, add_pos):
    """grid = (row_tiles,); weights are VMEM-resident (index_map (0,0))."""
    if add_pos:
        pos_ref, o_ref = rest
    else:
        (o_ref,) = rest

    x_f32 = x_ref[...].astype(jnp.float32)

    # FFN sublayer:  relu(x @ W1 + b1) @ W2      (b2 folded into BN shift)
    h = jnp.dot(x_ref[...].astype(jnp.bfloat16), w1_ref[...],
                preferred_element_type=jnp.float32)
    h = jnp.maximum(h + b1_ref[...], 0.0)
    acc = jnp.dot(h.astype(jnp.bfloat16), w2_ref[...],
                  preferred_element_type=jnp.float32)

    # residual + BatchNorm1d(eval) folded affine (+ b2), then optional pos.
    out = (x_f32 + acc) * scale_ref[...] + shift_ref[...]
    if add_pos:
        out = out + pos_ref[...].astype(jnp.float32)
    o_ref[...] = out.astype(o_ref.dtype)


def _pick_row_tile(m):
    """Largest divisor of m in {256,128,64,32,16,8}; fallback m (small inputs)."""
    for cand in (256, 128, 64, 32, 16, 8):
        if m % cand == 0:
            return cand
    # TODO(synk): pad M up to a multiple of 8 and mask the tail instead of
    #             falling back to a single ragged tile.
    return m


# ----------------------------------------------------------------------------
# Wrapper
# ----------------------------------------------------------------------------
def residual_batchnorm_pos_ffn(x, pos, add_pos, ffn_params, bn_params,
                               *, eps=1e-5):
    """x, pos: (B, S, D) float32.  Returns (B, S, D) float32."""
    B, S, D = x.shape
    add_pos = bool(add_pos)

    w1 = ffn_params["w1"].astype(jnp.bfloat16)               # (D, F)
    w2 = ffn_params["w2"].astype(jnp.bfloat16)               # (F, D)
    F = w1.shape[1]
    b1 = ffn_params["b1"].reshape(1, F).astype(jnp.float32)
    b2 = ffn_params["b2"].astype(jnp.float32)                 # (D,)

    # Fold eval-mode BatchNorm1d into per-channel scale/shift, and fold b2
    # into the shift:  ((x + hW2 + b2) - mean)*inv_std*gamma + beta
    #                = (x + hW2)*scale + (beta - mean*scale + b2*scale)
    inv_std = jax.lax.rsqrt(bn_params["running_var"].astype(jnp.float32) + eps)
    scale_v = bn_params["gamma"].astype(jnp.float32) * inv_std            # (D,)
    shift_v = (bn_params["beta"].astype(jnp.float32)
               - bn_params["running_mean"].astype(jnp.float32) * scale_v
               + b2 * scale_v)                                            # (D,)
    scale = scale_v.reshape(1, D)
    shift = shift_v.reshape(1, D)

    M = B * S
    x2 = x.reshape(M, D)

    tm = _pick_row_tile(M)                    # row tile (parallel axis)
    grid = (M // tm,)

    kernel = functools.partial(_res_bn_pos_ffn_kernel, add_pos=add_pos)

    in_specs = [
        pl.BlockSpec((tm, D), lambda i: (i, 0)),      # x rows
        pl.BlockSpec((D, F), lambda i: (0, 0)),       # W1 (resident, bf16)
        pl.BlockSpec((1, F), lambda i: (0, 0)),       # b1 (resident)
        pl.BlockSpec((F, D), lambda i: (0, 0)),       # W2 (resident, bf16)
        pl.BlockSpec((1, D), lambda i: (0, 0)),       # BN scale (resident)
        pl.BlockSpec((1, D), lambda i: (0, 0)),       # BN shift + b2 (resident)
    ]
    args = [x2, w1, b1, w2, scale, shift]
    if add_pos:
        in_specs.append(pl.BlockSpec((tm, D), lambda i: (i, 0)))  # pos rows
        args.append(pos.reshape(M, D))

    out = pl.pallas_call(
        kernel,
        out_shape=jax.ShapeDtypeStruct((M, D), x.dtype),
        grid=grid,
        in_specs=in_specs,
        out_specs=pl.BlockSpec((tm, D), lambda i: (i, 0)),
        compiler_params=pltpu.CompilerParams(
            dimension_semantics=("parallel",)),
    )(*args)

    return out.reshape(B, S, D)


# ----------------------------------------------------------------------------
# Pure-JAX reference (f32) for correctness check
# ----------------------------------------------------------------------------
def reference_forward(x, pos, add_pos, ffn_params, bn_params, eps=1e-5):
    h = jnp.maximum(x @ ffn_params["w1"] + ffn_params["b1"], 0.0)
    out = h @ ffn_params["w2"] + ffn_params["b2"]
    out = x + out
    out = ((out - bn_params["running_mean"])
           * jax.lax.rsqrt(bn_params["running_var"] + eps)
           * bn_params["gamma"] + bn_params["beta"])
    if add_pos:
        out = out + pos
    return out


# ----------------------------------------------------------------------------
# Main
# ----------------------------------------------------------------------------
if __name__ == "__main__":
    B, S, D, F = 2, 256, 128, 512           # d_model=128, FFN hidden=4*d_model

    key = jax.random.PRNGKey(0)
    ks = jax.random.split(key, 10)

    x = jax.random.normal(ks[0], (B, S, D), jnp.float32)
    pos = jax.random.normal(ks[1], (B, S, D), jnp.float32)

    ffn = dict(
        w1=jax.random.normal(ks[2], (D, F), jnp.float32) * 0.02,
        b1=jax.random.normal(ks[3], (F,), jnp.float32) * 0.02,
        w2=jax.random.normal(ks[4], (F, D), jnp.float32) * 0.02,
        b2=jax.random.normal(ks[5], (D,), jnp.float32) * 0.02,
    )
    bn = dict(
        gamma=1.0 + 0.1 * jax.random.normal(ks[6], (D,), jnp.float32),
        beta=0.1 * jax.random.normal(ks[7], (D,), jnp.float32),
        running_mean=0.05 * jax.random.normal(ks[8], (D,), jnp.float32),
        running_var=1.0 + 0.1 * jnp.abs(jax.random.normal(ks[9], (D,), jnp.float32)),
    )

    # add_pos = True path
    out = residual_batchnorm_pos_ffn(x, pos, True, ffn, bn)
    out = jax.block_until_ready(out)
    ref = reference_forward(x, pos, True, ffn, bn)
    assert out.shape == (B, S, D)
    assert bool(jnp.all(jnp.isfinite(out)))
    max_err = float(jnp.max(jnp.abs(out - ref)))
    assert max_err < 5e-2, f"max abs err {max_err}"

    # add_pos = False path (pos stream dropped entirely)
    out_np = residual_batchnorm_pos_ffn(x, pos, False, ffn, bn)
    out_np = jax.block_until_ready(out_np)
    ref_np = reference_forward(x, pos, False, ffn, bn)
    max_err_np = float(jnp.max(jnp.abs(out_np - ref_np)))
    assert max_err_np < 5e-2, f"max abs err (no pos) {max_err_np}"

    print("KERNEL_OK")
</pallas_src>

<mosaic_0001>
module attributes {stable_mosaic.version = 11 : i64} {
  func.func @_res_bn_pos_ffn_kernel(%arg0: i32, %arg1: memref<256x128xf32, #tpu.memory_space<vmem>>, %arg2: memref<128x512xbf16, #tpu.memory_space<vmem>>, %arg3: memref<1x512xf32, #tpu.memory_space<vmem>>, %arg4: memref<512x128xbf16, #tpu.memory_space<vmem>>, %arg5: memref<1x128xf32, #tpu.memory_space<vmem>>, %arg6: memref<1x128xf32, #tpu.memory_space<vmem>>, %arg7: memref<256x128xf32, #tpu.memory_space<vmem>>, %arg8: memref<256x128xf32, #tpu.memory_space<vmem>>) attributes {dimension_semantics = [#tpu.dimension_semantics<parallel>], iteration_bounds = array<i64: 2>, scalar_prefetch = 0 : i64, scratch_operands = 0 : i64, tpu.core_type = #tpu.core_type<tc>, window_params = [{transform_indices = @transform_0, window_bounds = array<i64: 256, 128>}, {pipeline_mode = #tpu.pipeline_mode<synchronous>, transform_indices = @transform_1, window_bounds = array<i64: 128, 512>}, {pipeline_mode = #tpu.pipeline_mode<synchronous>, transform_indices = @transform_2, window_bounds = array<i64: 1, 512>}, {pipeline_mode = #tpu.pipeline_mode<synchronous>, transform_indices = @transform_3, window_bounds = array<i64: 512, 128>}, {pipeline_mode = #tpu.pipeline_mode<synchronous>, transform_indices = @transform_4, window_bounds = array<i64: 1, 128>}, {pipeline_mode = #tpu.pipeline_mode<synchronous>, transform_indices = @transform_5, window_bounds = array<i64: 1, 128>}, {transform_indices = @transform_6, window_bounds = array<i64: 256, 128>}, {transform_indices = @transform_7, window_bounds = array<i64: 256, 128>}]} {
    %c0 = arith.constant 0 : index
    %c0_0 = arith.constant 0 : index
    %0 = vector.load %arg1[%c0, %c0_0] : memref<256x128xf32, #tpu.memory_space<vmem>>, vector<256x128xf32>
    %c0_1 = arith.constant 0 : index
    %c0_2 = arith.constant 0 : index
    %1 = vector.load %arg1[%c0_1, %c0_2] : memref<256x128xf32, #tpu.memory_space<vmem>>, vector<256x128xf32>
    %2 = arith.truncf %1 : vector<256x128xf32> to vector<256x128xbf16>
    %c0_3 = arith.constant 0 : index
    %c0_4 = arith.constant 0 : index
    %3 = vector.load %arg2[%c0_3, %c0_4] : memref<128x512xbf16, #tpu.memory_space<vmem>>, vector<128x512xbf16>
    %cst = arith.constant dense<0.000000e+00> : vector<256x512xf32>
    %4 = tpu.matmul %2, %3, %cst {dimension_numbers = #tpu.dot_dimension_numbers<[1], [0], [0], [1], [0, 0, 1, 1], [], []>} : vector<256x128xbf16>, vector<128x512xbf16>, vector<256x512xf32> -> vector<256x512xf32>
    %c0_5 = arith.constant 0 : index
    %c0_6 = arith.constant 0 : index
    %5 = vector.load %arg3[%c0_5, %c0_6] : memref<1x512xf32, #tpu.memory_space<vmem>>, vector<1x512xf32>
    %6 = vector.broadcast %5 : vector<1x512xf32> to vector<256x512xf32>
    %7 = arith.addf %4, %6 : vector<256x512xf32>
    %cst_7 = arith.constant 0.000000e+00 : f32
    %8 = vector.broadcast %cst_7 : f32 to vector<256x512xf32>
    %9 = arith.maximumf %7, %8 : vector<256x512xf32>
    %10 = arith.truncf %9 : vector<256x512xf32> to vector<256x512xbf16>
    %c0_8 = arith.constant 0 : index
    %c0_9 = arith.constant 0 : index
    %11 = vector.load %arg4[%c0_8, %c0_9] : memref<512x128xbf16, #tpu.memory_space<vmem>>, vector<512x128xbf16>
    %cst_10 = arith.constant dense<0.000000e+00> : vector<256x128xf32>
    %12 = tpu.matmul %10, %11, %cst_10 {dimension_numbers = #tpu.dot_dimension_numbers<[1], [0], [0], [1], [0, 0, 1, 1], [], []>} : vector<256x512xbf16>, vector<512x128xbf16>, vector<256x128xf32> -> vector<256x128xf32>
    %13 = arith.addf %0, %12 : vector<256x128xf32>
    %c0_11 = arith.constant 0 : index
    %c0_12 = arith.constant 0 : index
    %14 = vector.load %arg5[%c0_11, %c0_12] : memref<1x128xf32, #tpu.memory_space<vmem>>, vector<1x128xf32>
    %15 = vector.broadcast %14 : vector<1x128xf32> to vector<256x128xf32>
    %16 = arith.mulf %13, %15 : vector<256x128xf32>
    %c0_13 = arith.constant 0 : index
    %c0_14 = arith.constant 0 : index
    %17 = vector.load %arg6[%c0_13, %c0_14] : memref<1x128xf32, #tpu.memory_space<vmem>>, vector<1x128xf32>
    %18 = vector.broadcast %17 : vector<1x128xf32> to vector<256x128xf32>
    %19 = arith.addf %16, %18 : vector<256x128xf32>
    %c0_15 = arith.constant 0 : index
    %c0_16 = arith.constant 0 : index
    %20 = vector.load %arg7[%c0_15, %c0_16] : memref<256x128xf32, #tpu.memory_space<vmem>>, vector<256x128xf32>
    %21 = arith.addf %19, %20 : vector<256x128xf32>
    %c0_17 = arith.constant 0 : index
    %c0_18 = arith.constant 0 : index
    %22 = vector.load %arg8[%c0_17, %c0_18] : memref<256x128xf32, #tpu.memory_space<vmem>>, vector<256x128xf32>
    tpu.vector_store %arg8[%c0_17, %c0_18], %21 {strides = array<i32>} : memref<256x128xf32, #tpu.memory_space<vmem>>, vector<256x128xf32>,
    return
  }
  func.func @transform_0(%arg0: i32) -> (i32, i32) {
    %c0_i32 = arith.constant 0 : i32
    %c0_i32_0 = arith.constant 0 : i32
    return %arg0, %c0_i32 : i32, i32
  }
  func.func @transform_1(%arg0: i32) -> (i32, i32) {
    %c0_i32 = arith.constant 0 : i32
    %c0_i32_0 = arith.constant 0 : i32
    %c0_i32_1 = arith.constant 0 : i32
    return %c0_i32, %c0_i32_0 : i32, i32
  }
  func.func @transform_2(%arg0: i32) -> (i32, i32) {
    %c0_i32 = arith.constant 0 : i32
    %c0_i32_0 = arith.constant 0 : i32
    %c0_i32_1 = arith.constant 0 : i32
    return %c0_i32, %c0_i32_0 : i32, i32
  }
  func.func @transform_3(%arg0: i32) -> (i32, i32) {
    %c0_i32 = arith.constant 0 : i32
    %c0_i32_0 = arith.constant 0 : i32
    %c0_i32_1 = arith.constant 0 : i32
    return %c0_i32, %c0_i32_0 : i32, i32
  }
  func.func @transform_4(%arg0: i32) -> (i32, i32) {
    %c0_i32 = arith.constant 0 : i32
    %c0_i32_0 = arith.constant 0 : i32
    %c0_i32_1 = arith.constant 0 : i32
    return %c0_i32, %c0_i32_0 : i32, i32
  }
  func.func @transform_5(%arg0: i32) -> (i32, i32) {
    %c0_i32 = arith.constant 0 : i32
    %c0_i32_0 = arith.constant 0 : i32
    %c0_i32_1 = arith.constant 0 : i32
    return %c0_i32, %c0_i32_0 : i32, i32
  }
  func.func @transform_6(%arg0: i32) -> (i32, i32) {
    %c0_i32 = arith.constant 0 : i32
    %c0_i32_0 = arith.constant 0 : i32
    return %arg0, %c0_i32 : i32, i32
  }
  func.func @transform_7(%arg0: i32) -> (i32, i32) {
    %c0_i32 = arith.constant 0 : i32
    %c0_i32_0 = arith.constant 0 : i32
    return %arg0, %c0_i32 : i32, i32
  }
}

</mosaic_0001>

<bundles_post_ra>
// kernel: tpu_custom_call.1
= control target key start
LH: loop header
LB: loop body
LE: loop exit
PB: predicated region body
PF: predicated region fallthrough
CT: control target
= control target key end

     0   :  { %s3551_s0 = inlined_call_operand.hbm [shape: f32[512,128], index: 0, kind: input, shape index: {}]   ;;  %s3552_s1 = inlined_call_operand.hbm [shape: bf16[128,512], index: 1, kind: input, shape index: {}]   ;;  %s3553_s2 = inlined_call_operand.vmem [shape: f32[1,512], index: 2, kind: input, shape index: {}]   ;;  %s3554_s3 = inlined_call_operand.hbm [shape: bf16[512,128], index: 3, kind: input, shape index: {}]   ;;  %s3555_s4 = inlined_call_operand.vmem [shape: f32[1,128], index: 4, kind: input, shape index: {}]   ;;  %s3556_s5 = inlined_call_operand.vmem [shape: f32[1,128], index: 5, kind: input, shape index: {}]   ;;  %s3557_s6 = inlined_call_operand.hbm [shape: f32[512,128], index: 6, kind: input, shape index: {}]   ;;  %s3558_s7 = inlined_call_operand.hbm [shape: f32[512,128], index: 7, kind: output, shape index: {}]  }
   0x1   :  { %3564 = sst [smem:[#allocation16_spill]] %s3551_s0 }
   0x2   :  { %3565 = sst [smem:[#allocation17_spill]] %s3552_s1 }
   0x3   :  { %3566 = sst [smem:[#allocation18_spill]] %s3554_s3 }
   0x4   :  { %12 = vsyncpa [#allocation3], 0 }
   0x5   :  { %14 = vsyncpa [#allocation3 + $0x1], 0 }
   0x6   :  { %15 = vsyncpa [#allocation6], 0 }
   0x7   :  { %16 = vsyncpa [#allocation9], 0 }
   0x8   :  { %18 = vsyncpa [#allocation9 + $0x1], 0 }
   0x9   :  { %19 = vsyncpa [#allocation4], 0 }
   0xa   :  { %21 = vsyncpa [#allocation4 + $0x1], 0  ;;  %s2877_s24 = smov 0   ;;  %s2879_s25 = smov 0  }
   0xb   :  { %s2881_s26 = smov 0   ;;  %s2883_s27 = smov 0  }
   0xc LB: > { %s2898_s28 = sadd.s32 4294967295, %s2821_s27   ;;  %s2123_s29 = sadd.s32 4294967294, %s2821_s27   ;;  %s2821_s27 = sphi %s2883_s27, %s3590_s27   ;;  %s2817_s26 = sphi %s2881_s26, %s3589_s26   ;;  %s2813_s25 = sphi %s2879_s25, %s3588_s25   ;;  %s2809_s24 = sphi %s2877_s24, %s3587_s24  }
   0xd   : > { %p47_p0 = scmp.ne.s32.totalorder %s2813_s25, %s2809_s24  ;;  %p3559_p1 = scmp.eq.s32.totalorder %s2898_s28, 0 }
   0xe   : > { %p208_p3 = scmp.eq.s32.totalorder %s2123_s29, 1  ;;  %p2124_p5 = scmp.ge.s32.totalorder %s2821_s27, 1 }
   0xf   : > { %p2907_p4 = por %p3559_p1, %p47_p0  ;;  %p215_p7 = scmp.lt.s32.totalorder %s2821_s27, 3 }
  0x10   : > { %p2912_p6 = por %p208_p3, %p47_p0  ;;  %s2823_s10 = smov [#allocation5]  }
  0x11   : > { %s3567_s30 = scalar_select %p2907_p4, 1, 0 }
  0x12   : > { %s3568_s8 = scalar_select %p2912_p6, 1, 0 }
  0x13   : > { %p2917_p8 = pnand %p2124_p5, %p215_p7  ;;  %s227_s11 = sshll.u32 %s2823_s10, 4  ;;  %s2921_s11 = int_to_ptr.vmem [resolvable:$true] %s227_s11 }
  0x14   : > { %s2824_s13 = smov [#allocation7]   ;;  %s3571_s1 = sld [smem:[#allocation17_spill]] }
  0x15   : > { %p2452_p9 = pneg %p2917_p8  ;;  %s243_s14 = sshll.u32 %s2824_s13, 4  ;;  %s2932_s14 = int_to_ptr.vmem [resolvable:$true] %s243_s14 }
  0x17   : > { %p2928_p11 = pnand %p2452_p9, %p3559_p1 }
  0x19   : > { %p2633_p13 = pneg %p2928_p11 }
  0x1a   : > { %s2631_s17 = scalar_lea.hbm %s3571_s1, 4096 }
  0x1b   : > { %p2632_p12 = scmp.ne.s32.totalorder %s3571_s1, %s2631_s17  ;;  %p2638_p5 = scmp.lt.u32.totalorder %s2631_s17, %s3571_s1 }
  0x1d   : > { %p2634_p0 = pnand %p2633_p13, %p2632_p12 }
  0x1f   : > { %p2635_p3 = pneg %p2634_p0 }
  0x21   : > { %p2640_p7 = pnand %p2638_p5, %p2635_p3 }
  0x23   : > { %2643 = shalt.err (!%p2640_p7)
}
  0x24   : > { %s2644_s22 = scalar_lea.vmem %s2921_s11, 4096  ;;  %p2652_p2 = scmp.lt.s32.totalorder %s2921_s11, %s2921_s11 }
  0x25   : > { %p2645_p9 = scmp.ne.s32.totalorder %s2921_s11, %s2644_s22  ;;  %p2653_p12 = scmp.lt.s32.totalorder %s2644_s22, %s2644_s22 }
  0x27   : > { %p2647_p10 = pnand %p2645_p9, %p2633_p13  ;;  %p2654_p0 = por %p2653_p12, %p2652_p2 }
  0x29   : > { %p2648_p1 = pneg %p2647_p10 }
  0x2b   : > { %p2655_p6 = pnand %p2654_p0, %p2648_p1 }
  0x2d   : > { %2658 = shalt.err (!%p2655_p6)
}
  0x2e   : > { %s2825_s23 = smov 256   ;;  %s2826_s29 = smov 16  }
  0x2f   : > { %2455 = dma.hbm_to_vmem [thread:$0]  (!%p2928_p11), %s3571_s1, 4096, %s2921_s11, [#allocation6], %s2825_s23, %s2825_s23, %s2826_s29  }
  0x30   : > { %s3572_s3 = sld [smem:[#allocation18_spill]] }
  0x36   : > { %s2659_s17 = scalar_lea.hbm %s3572_s3, 4096 }
  0x37   : > { %p2660_p2 = scmp.ne.s32.totalorder %s3572_s3, %s2659_s17  ;;  %p2666_p10 = scmp.lt.u32.totalorder %s2659_s17, %s3572_s3 }
  0x39   : > { %p2662_p1 = pnand %p2660_p2, %p2633_p13 }
  0x3b   : > { %p2663_p6 = pneg %p2662_p1 }
  0x3d   : > { %p2668_p3 = pnand %p2666_p10, %p2663_p6 }
  0x3f   : > { %2671 = shalt.err (!%p2668_p3)
}
  0x40   : > { %s2672_s11 = scalar_lea.vmem %s2932_s14, 4096  ;;  %p2680_p12 = scmp.lt.s32.totalorder %s2932_s14, %s2932_s14 }
  0x41   : > { %p2673_p5 = scmp.ne.s32.totalorder %s2932_s14, %s2672_s11  ;;  %p2681_p0 = scmp.lt.s32.totalorder %s2672_s11, %s2672_s11 }
  0x43   : > { %p2675_p7 = pnand %p2673_p5, %p2633_p13  ;;  %p2682_p2 = por %p2681_p0, %p2680_p12 }
  0x45   : > { %p2676_p9 = pneg %p2675_p7 }
  0x47   : > { %p2683_p1 = pnand %p2682_p2, %p2676_p9 }
  0x49   : > { %2686 = shalt.err (!%p2683_p1)
}
  0x4a   : > { %s2827_s22 = smov 64   ;;  %s2828_s23 = smov 4  }
  0x4b   : > { %2458 = dma.hbm_to_vmem [thread:$0]  (!%p2928_p11), %s3572_s3, 4096, %s2932_s14, [#allocation6], %s2827_s22, %s2827_s22, %s2828_s23  }
  0x4c   : > { %s2987_s13 = sadd.s32 1, %s2821_s27   ;;  %s34_s16 = sadd.s32 1, %s2817_s26 }
  0x4d   : > { %s31_s15 = ssub.s32 %s2821_s27, %s2987_s13  ;;  %p41_p6 = scmp.ne.s32.totalorder %s2817_s26, %s2813_s25 }
  0x4e   : > { %p32_p13 = scmp.eq.s32.totalorder %s31_s15, 0  ;;  %p42_p10 = scmp.eq.s32.totalorder %s2821_s27, 0 }
  0x4f   : > { %p3574_p5 = scmp.eq.s32.totalorder %s2898_s28, 1  ;;  %p2472_p9 = scmp.lt.s32.totalorder %s2821_s27, 2 }
  0x50   : > { %s2996_s17 = scalar_select %p32_p13, %s2817_s26, %s34_s16  }
  0x51   : > { %p43_p3 = por %p42_p10, %p41_p6  ;;  %p3000_p7 = por %p3574_p5, %p41_p6 }
  0x52   : > { %3573 = sst [smem:[#allocation15_spill]] %s2996_s17  ;;  %s3006_s12 = sand.u32 1, %s2817_s26  }
  0x53   : > { %s3575_s18 = scalar_select %p3000_p7, 1, 0 }
  0x54   : > { %s3560_s14 = sshll.u32 %s3006_s12, 8  ;;  %s3561_s19 = sshll.u32 %s2821_s27, 12 }
  0x55   : > { %s3576_s0 = sld [smem:[#allocation16_spill]]  ;;  %s267_s22 = scalar_lea.vmem [#allocation2], %s3560_s14 }
  0x56   : > { %s274_s23 = sshll.u32 %s267_s22, 4  ;;  %p3021_p11 = pnand %p2472_p9, %p43_p3  ;;  %s3019_s23 = int_to_ptr.vmem [resolvable:$true] %s274_s23 }
  0x57   : > { %s264_s10 = scalar_lea.sflag [#allocation3], %s3006_s12 }
  0x58   : > { %p2689_p0 = pneg %p3021_p11 }
  0x5b   : > { %s3015_s11 = scalar_lea.hbm %s3576_s0, %s3561_s19  ;;  %s2692_s21 = scalar_lea.hbm %s3576_s0, 8192 }
  0x5c   : > { %s2687_s15 = scalar_lea.hbm %s3015_s11, 4096  ;;  %p2693_p13 = scmp.lt.u32.totalorder %s3015_s11, %s3576_s0 }
  0x5d   : > { %p2688_p12 = scmp.ne.s32.totalorder %s3015_s11, %s2687_s15  ;;  %p2694_p6 = scmp.lt.u32.totalorder %s2692_s21, %s2687_s15 }
  0x5e   : > { %p2696_p3 = scmp.lt.u32.totalorder %s2687_s15, %s3015_s11 }
  0x5f   : > { %p2690_p2 = pnand %p2689_p0, %p2688_p12  ;;  %p2695_p10 = por %p2694_p6, %p2693_p13 }
  0x61   : > { %p2691_p1 = pneg %p2690_p2  ;;  %p2697_p5 = por %p2696_p3, %p2695_p10 }
  0x63   : > { %p2698_p9 = pnand %p2697_p5, %p2691_p1 }
  0x65   : > { %2701 = shalt.err (!%p2698_p9)
}
  0x66   : > { %s2702_s19 = scalar_lea.vmem %s3019_s23, 4096  ;;  %s2829_s16 = smov [#allocation2]  }
  0x67   : > { %p2703_p12 = scmp.ne.s32.totalorder %s3019_s23, %s2702_s19  ;;  %s2707_s20 = sshll.u32 %s2829_s16, 4  ;;  %s2708_s20 = int_to_ptr.vmem [resolvable:$false] %s2707_s20 }
  0x68   : > { %s2709_s14 = scalar_lea.vmem %s2708_s20, 8192  ;;  %p2710_p4 = scmp.lt.s32.totalorder %s3019_s23, %s2708_s20 }
  0x69   : > { %p2705_p2 = pnand %p2703_p12, %p2689_p0  ;;  %p2711_p13 = scmp.lt.s32.totalorder %s2709_s14, %s2702_s19 }
  0x6b   : > { %p2706_p7 = pneg %p2705_p2  ;;  %p2712_p6 = por %p2711_p13, %p2710_p4 }
  0x6d   : > { %p2713_p10 = pnand %p2712_p6, %p2706_p7 }
  0x6f   : > { %2716 = shalt.err (!%p2713_p10)
}
  0x70   : > { %s2830_s15 = smov 128   ;;  %s2831_s21 = smov 8  }
  0x71   : > { %2462 = dma.hbm_to_vmem [thread:$0]  (!%p3021_p11), %s3015_s11, 4096, %s3019_s23, %s264_s10, %s2830_s15, %s2830_s15, %s2831_s21  }
  0x72   : > { %s3578_s19 = sshll.u32 %s2821_s27, 12  ;;  %s3579_s14 = sshll.u32 %s3006_s12, 8 }
  0x73   : > { %s3061_s20 = scalar_lea.hbm %s3557_s6, %s3578_s19  ;;  %s288_s0 = scalar_lea.vmem [#allocation8], %s3579_s14 }
  0x74   : > { %s295_s1 = sshll.u32 %s288_s0, 4  ;;  %s285_s3 = scalar_lea.sflag [#allocation9], %s3006_s12  ;;  %s3065_s1 = int_to_ptr.vmem [resolvable:$true] %s295_s1 }
  0x75   : > { %s2717_s17 = scalar_lea.hbm %s3061_s20, 4096  ;;  %s2722_s10 = scalar_lea.hbm %s3557_s6, 8192 }
  0x76   : > { %p2718_p4 = scmp.ne.s32.totalorder %s3061_s20, %s2717_s17  ;;  %p2723_p3 = scmp.lt.u32.totalorder %s3061_s20, %s3557_s6 }
  0x77   : > { %p2724_p5 = scmp.lt.u32.totalorder %s2722_s10, %s2717_s17  ;;  %p2726_p12 = scmp.lt.u32.totalorder %s2717_s17, %s3061_s20 }
  0x78   : > { %p2720_p7 = pnand %p2718_p4, %p2689_p0 }
  0x79   : > { %p2725_p9 = por %p2724_p5, %p2723_p3 }
  0x7a   : > { %p2721_p1 = pneg %p2720_p7 }
  0x7b   : > { %p2727_p2 = por %p2726_p12, %p2725_p9 }
  0x7d   : > { %p2728_p13 = pnand %p2727_p2, %p2721_p1 }
  0x7f   : > { %2731 = shalt.err (!%p2728_p13)
}
  0x80   : > { %s2732_s0 = scalar_lea.vmem %s3065_s1, 4096  ;;  %s2832_s16 = smov [#allocation8]  }
  0x81   : > { %p2733_p6 = scmp.ne.s32.totalorder %s3065_s1, %s2732_s0  ;;  %s2737_s14 = sshll.u32 %s2832_s16, 4  ;;  %s2738_s14 = int_to_ptr.vmem [resolvable:$false] %s2737_s14 }
  0x82   : > { %s2739_s11 = scalar_lea.vmem %s2738_s14, 8192  ;;  %p2740_p7 = scmp.lt.s32.totalorder %s3065_s1, %s2738_s14 }
  0x83   : > { %p2735_p10 = pnand %p2733_p6, %p2689_p0  ;;  %p2741_p3 = scmp.lt.s32.totalorder %s2739_s11, %s2732_s0 }
  0x85   : > { %p2736_p4 = pneg %p2735_p10  ;;  %p2742_p5 = por %p2741_p3, %p2740_p7 }
  0x87   : > { %p2743_p9 = pnand %p2742_p5, %p2736_p4 }
  0x89   : > { %2746 = shalt.err (!%p2743_p9)
}
  0x8a   : > { %2465 = dma.hbm_to_vmem [thread:$0]  (!%p3021_p11), %s3061_s20, 4096, %s3065_s1, %s285_s3, %s2830_s15, %s2830_s15, %s2831_s21  }
  0x8b   : > { %307 = sbr.rel (%p2917_p8) target bundleno = 772 (0x304), region = 48  ;;  %s3099_s17 = sand.u32 (!%p2917_p8), 1, %s2813_s25  }
  0x8c   : > { %s3102_s23 = sshll.u32 (!%p2917_p8), %s3099_s17, 8  ;;  %s310_s29 = scalar_lea.sflag (!%p2917_p8), [#allocation3], %s3099_s17 }
  0x8d   : > { %s3106_s10 = scalar_lea.vmem (!%p2917_p8), [#allocation2], %s3102_s23  ;;  %p3580_p0 = scmp.ne.s32.totalorder (!%p2917_p8), %s3567_s30, 0 }
  0x92   : > { %2792 = dma.done.wait (%p3580_p0), %s310_s29, 4096  }
  0x93   : > { %2794 = vsyncadd (%p3580_p0), %s310_s29, 4294963200  ;;  %p3581_p11 = scmp.eq.s32.totalorder %s2898_s28, 0 }
  0x95   : > { %2796 = dma.done.wait (%p3581_p11), [#allocation6], 8192   ;;  %p3582_p8 = pmov %p3581_p11 }
  0x96   : > { %s327_s1 = scalar_lea.sflag [#allocation9], %s3099_s17  ;;  %s3118_s3 = scalar_lea.vmem [#allocation8], %s3102_s23 }
  0x97   : > { %2798 = vsyncadd (%p3582_p8), [#allocation6], 4294959104 }
  0x98   : > { %2800 = dma.done.wait (%p3580_p0), %s327_s1, 4096  }
  0x99   : > { %2802 = vsyncadd (%p3580_p0), %s327_s1, 4294963200  ;;  %v2833_v0 = vmov 0   ;;  %v2519_v1 = vld [vmem:[#allocation5 + $0x4] ss:$16 sps:$4 sm:$0xff]   ;;  %v2521_v2 = vld [vmem:[#allocation5 + $0xc] ss:$16 sps:$4 sm:$0xff]  }
  0x9a   : > { %664 = vmatprep.mubr.bf16.mxu0 %v2833_v0  ;;  %857 = vmatprep.mubr.bf16.mxu1 %v2833_v0  ;;  %v2523_v3 = vld [vmem:[#allocation5] ss:$16 sps:$4 sm:$0xff]   ;;  %v2524_v4 = vld [vmem:[#allocation5 + $0x8] ss:$16 sps:$4 sm:$0xff]   ;;  %v2525_v5 = vld [vmem:[#allocation5 + $0x24] ss:$16 sps:$4 sm:$0xff]  }
  0x9b   : > { %632 = vmatprep.subr.bf16.mxu0 %v2519_v1  ;;  %825 = vmatprep.subr.bf16.mxu1 %v2521_v2  ;;  %v2527_v6 = vld [vmem:[#allocation5 + $0x2c] ss:$16 sps:$4 sm:$0xff]   ;;  %v2529_v7 = vld [vmem:[#allocation5 + $0x20] ss:$16 sps:$4 sm:$0xff]   ;;  %v2530_v8 = vld [vmem:[#allocation5 + $0x28] ss:$16 sps:$4 sm:$0xff]  }
  0x9c   : > { %633 = vmatpush1.bf16.msra.mxu0 %v2523_v3  ;;  %826 = vmatpush1.bf16.msra.mxu1 %v2524_v4  ;;  %v2531_v9 = vld [vmem:[#allocation5 + $0x44] ss:$16 sps:$4 sm:$0xff]   ;;  %v2533_v10 = vld [vmem:[#allocation5 + $0x4c] ss:$16 sps:$4 sm:$0xff]   ;;  %v2535_v11 = vld [vmem:[#allocation5 + $0x40] ss:$16 sps:$4 sm:$0xff]  }
  0x9d   : > { %634 = vmatprep.subr.bf16.mxu0 %v2525_v5  ;;  %827 = vmatprep.subr.bf16.mxu1 %v2527_v6  ;;  %v2536_v12 = vld [vmem:[#allocation5 + $0x48] ss:$16 sps:$4 sm:$0xff]   ;;  %v2537_v13 = vld [vmem:[#allocation5 + $0x64] ss:$16 sps:$4 sm:$0xff]   ;;  %v2539_v14 = vld [vmem:[#allocation5 + $0x6c] ss:$16 sps:$4 sm:$0xff]  }
  0x9e   : > { %v2541_v15 = vld [vmem:[#allocation5 + $0x60] ss:$16 sps:$4 sm:$0xff]   ;;  %v2542_v16 = vld [vmem:[#allocation5 + $0x68] ss:$16 sps:$4 sm:$0xff]   ;;  %v2543_v17 = vld [vmem:[#allocation5 + $0x84] ss:$16 sps:$4 sm:$0xff]  }
  0x9f   : > { %v2545_v18 = vld [vmem:[#allocation5 + $0x8c] ss:$16 sps:$4 sm:$0xff]   ;;  %v2547_v19 = vld [vmem:[#allocation5 + $0x80] ss:$16 sps:$4 sm:$0xff]   ;;  %v2548_v20 = vld [vmem:[#allocation5 + $0x88] ss:$16 sps:$4 sm:$0xff]  }
  0xa0   : > { %635 = vmatpush1.bf16.msra.mxu0 %v2529_v7  ;;  %828 = vmatpush1.bf16.msra.mxu1 %v2530_v8  ;;  %v2549_v21 = vld [vmem:[#allocation5 + $0xa4] ss:$16 sps:$4 sm:$0xff]   ;;  %v2551_v22 = vld [vmem:[#allocation5 + $0xac] ss:$16 sps:$4 sm:$0xff]   ;;  %v2553_v23 = vld [vmem:[#allocation5 + $0xa0] ss:$16 sps:$4 sm:$0xff]  }
  0xa1   : > { %636 = vmatprep.subr.bf16.mxu0 %v2531_v9  ;;  %829 = vmatprep.subr.bf16.mxu1 %v2533_v10  ;;  %v2554_v24 = vld [vmem:[#allocation5 + $0xa8] ss:$16 sps:$4 sm:$0xff]   ;;  %v2555_v25 = vld [vmem:[#allocation5 + $0xc4] ss:$16 sps:$4 sm:$0xff]   ;;  %v2557_v26 = vld [vmem:[#allocation5 + $0xcc] ss:$16 sps:$4 sm:$0xff]  }
  0xa2   : > { %v2559_v27 = vld [vmem:[#allocation5 + $0xc0] ss:$16 sps:$4 sm:$0xff]   ;;  %v2560_v28 = vld [vmem:[#allocation5 + $0xc8] ss:$16 sps:$4 sm:$0xff]   ;;  %v2561_v29 = vld [vmem:[#allocation5 + $0xe4] ss:$16 sps:$4 sm:$0xff]  }
  0xa3   : > { %v2563_v30 = vld [vmem:[#allocation5 + $0xec] ss:$16 sps:$4 sm:$0xff]   ;;  %v2565_v31 = vld [vmem:[#allocation5 + $0xe0] ss:$16 sps:$4 sm:$0xff]   ;;  %v2566_v32 = vld [vmem:[#allocation5 + $0xe8] ss:$16 sps:$4 sm:$0xff]  }
  0xa4   : > { %637 = vmatpush1.bf16.msra.mxu0 %v2535_v11  ;;  %830 = vmatpush1.bf16.msra.mxu1 %v2536_v12  ;;  %v370_v33 = vld [vmem:[%s3106_s10] sm:$0xff]  ;;  %v371_v34 = vld [vmem:[%s3106_s10 + $0x8] sm:$0xff]  ;;  %v372_v40 = vld [vmem:[%s3106_s10 + $0x10] sm:$0xff]  ;;  %s3346_s19 = scalar_lea.vmem [#allocation10], %s3102_s23  ;;  %s2213_s22 = sshll.u32 %s2898_s28, 12 }
  0xa5   : > { %638 = vmatprep.subr.bf16.mxu0 %v2537_v13  ;;  %831 = vmatprep.subr.bf16.mxu1 %v2539_v14  ;;  %v2567_v35 = vld [vmem:[#allocation7 + $0x40] sm:$0xff]   ;;  %v402_v36 = vpack.c.bf16 %v371_v34, %v370_v33  ;;  %v373_v41 = vld [vmem:[%s3106_s10 + $0x18] sm:$0xff]  ;;  %v2571_v42 = vld [vmem:[#allocation7 + $0x48] sm:$0xff]   ;;  %s2008_s0 = sshll.u32 %s3346_s19, 4  ;;  %s3504_s11 = scalar_lea.hbm %s3558_s7, %s2213_s22  ;;  %s3506_s0 = int_to_ptr.vmem [resolvable:$true] %s2008_s0 }
  0xa6   : > { %v2568_v37 = vld [vmem:[#allocation7 + $0xc0] sm:$0xff]   ;;  %v2572_v43 = vld [vmem:[#allocation7 + $0xc8] sm:$0xff]   ;;  %v403_v46 = vpack.c.bf16 %v373_v41, %v372_v40  ;;  %v2575_v47 = vld [vmem:[#allocation7 + $0x50] sm:$0xff]   ;;  %s1995_s23 = scalar_lea.sflag [#allocation4], %s3099_s17  ;;  %s2747_s28 = scalar_lea.vmem %s3506_s0, 4096 }
  0xa7   : > { %v2569_v38 = vld [vmem:[#allocation7] sm:$0xff]   ;;  %v2573_v44 = vld [vmem:[#allocation7 + $0x8] sm:$0xff]   ;;  %v2576_v48 = vld [vmem:[#allocation7 + $0xd0] sm:$0xff]   ;;  %p2748_p1 = scmp.ne.s32.totalorder %s3506_s0, %s2747_s28  ;;  %p3583_p12 = scmp.ne.s32.totalorder %s3575_s18, 0 }
  0xa8   : > { %639 = vmatpush1.bf16.msra.mxu0 %v2541_v15  ;;  %832 = vmatpush1.bf16.msra.mxu1 %v2542_v16  ;;  %v2570_v39 = vld [vmem:[#allocation7 + $0x80] sm:$0xff]   ;;  %v2574_v45 = vld [vmem:[#allocation7 + $0x88] sm:$0xff]   ;;  %v2577_v51 = vld [vmem:[#allocation7 + $0x10] sm:$0xff]   ;;  %s2834_s29 = smov [#allocation10]  }
  0xa9   : > { %640 = vmatprep.subr.bf16.mxu0 %v2543_v17  ;;  %833 = vmatprep.subr.bf16.mxu1 %v2545_v18  ;;  %v374_v49 = vld [vmem:[%s3106_s10 + $0x20] sm:$0xff]  ;;  %v375_v50 = vld [vmem:[%s3106_s10 + $0x28] sm:$0xff]  ;;  %v2578_v52 = vld [vmem:[#allocation7 + $0x90] sm:$0xff]   ;;  %p2749_p2 = pnand %p2748_p1, %p3583_p12 }
  0xaa   : > { %v2579_v53 = vld [vmem:[#allocation7 + $0x58] sm:$0xff]   ;;  %v404_v56 = vpack.c.bf16 %v375_v50, %v374_v49  ;;  %v2583_v58 = vld [vmem:[#allocation7 + $0x60] sm:$0xff]   ;;  %v376_v60 = vld [vmem:[%s3106_s10 + $0x30] sm:$0xff]  ;;  %v452_v50 = vlaneseq }
  0xab   : > { %v2580_v54 = vld [vmem:[#allocation7 + $0xd8] sm:$0xff]   ;;  %v2584_v59 = vld [vmem:[#allocation7 + $0xe0] sm:$0xff]   ;;  %v2587_v1 = vld [vmem:[#allocation7 + $0x68] sm:$0xff]   ;;  %p2750_p13 = pneg %p2749_p2 }
  0xac   : > { %641 = vmatpush1.bf16.msra.mxu0 %v2547_v19  ;;  %834 = vmatpush1.bf16.msra.mxu1 %v2548_v20  ;;  %v2581_v55 = vld [vmem:[#allocation7 + $0x18] sm:$0xff]   ;;  %v2585_v62 = vld [vmem:[#allocation7 + $0x20] sm:$0xff]   ;;  %v2588_v2 = vld [vmem:[#allocation7 + $0xe8] sm:$0xff]  }
  0xad   : > { %642 = vmatprep.subr.bf16.mxu0 %v2549_v21  ;;  %835 = vmatprep.subr.bf16.mxu1 %v2551_v22  ;;  %v2582_v57 = vld [vmem:[#allocation7 + $0x98] sm:$0xff]   ;;  %v2586_v63 = vld [vmem:[#allocation7 + $0xa0] sm:$0xff]   ;;  %v2589_v3 = vld [vmem:[#allocation7 + $0x28] sm:$0xff]  }
  0xae   : > { %v377_v61 = vld [vmem:[%s3106_s10 + $0x38] sm:$0xff]  ;;  %v2590_v5 = vld [vmem:[#allocation7 + $0xa8] sm:$0xff]   ;;  %v2591_v6 = vld [vmem:[#allocation7 + $0x70] sm:$0xff]  }
  0xaf   : > { %v405_v4 = vpack.c.bf16 %v377_v61, %v376_v60  ;;  %v2592_v7 = vld [vmem:[#allocation7 + $0xf0] sm:$0xff]   ;;  %v378_v8 = vld [vmem:[%s3106_s10 + $0x40] sm:$0xff]  ;;  %v379_v9 = vld [vmem:[%s3106_s10 + $0x48] sm:$0xff] }
  0xb0   : > { %643 = vmatpush1.bf16.msra.mxu0 %v2553_v23  ;;  %836 = vmatpush1.bf16.msra.mxu1 %v2554_v24  ;;  %v2593_v10 = vld [vmem:[#allocation7 + $0x30] sm:$0xff]   ;;  %v2595_v12 = vld [vmem:[#allocation7 + $0x78] sm:$0xff]   ;;  %v406_v15 = vpack.c.bf16 %v379_v9, %v378_v8  ;;  %v382_v20 = vld [vmem:[%s3106_s10 + $0x60] sm:$0xff] }
  0xb1   : > { %644 = vmatprep.subr.bf16.mxu0 %v2555_v25  ;;  %837 = vmatprep.subr.bf16.mxu1 %v2557_v26  ;;  %v2594_v11 = vld [vmem:[#allocation7 + $0xb0] sm:$0xff]   ;;  %v2596_v13 = vld [vmem:[#allocation7 + $0xf8] sm:$0xff]   ;;  %v383_v21 = vld [vmem:[%s3106_s10 + $0x68] sm:$0xff] }
  0xb2   : > { %v2597_v14 = vld [vmem:[#allocation7 + $0x38] sm:$0xff]   ;;  %v380_v17 = vld [vmem:[%s3106_s10 + $0x50] sm:$0xff]  ;;  %v408_v22 = vpack.c.bf16 %v383_v21, %v382_v20  ;;  %v386_v26 = vld [vmem:[%s3106_s10 + $0x80] sm:$0xff] }
  0xb3   : > { %v2598_v16 = vld [vmem:[#allocation7 + $0xb8] sm:$0xff]   ;;  %v384_v23 = vld [vmem:[%s3106_s10 + $0x70] sm:$0xff]  ;;  %v391_v33 = vld [vmem:[%s3106_s10 + $0xa8] sm:$0xff] }
  0xb4   : > { %645 = vmatpush1.bf16.msra.mxu0 %v2559_v27  ;;  %838 = vmatpush1.bf16.msra.mxu1 %v2560_v28  ;;  %v381_v18 = vld [vmem:[%s3106_s10 + $0x58] sm:$0xff]  ;;  %v387_v27 = vld [vmem:[%s3106_s10 + $0x88] sm:$0xff]  ;;  %v396_v41 = vld [vmem:[%s3106_s10 + $0xd0] sm:$0xff] }
  0xb5   : > { %646 = vmatprep.subr.bf16.mxu0 %v2561_v29  ;;  %839 = vmatprep.subr.bf16.mxu1 %v2563_v30  ;;  %v407_v19 = vpack.c.bf16 %v381_v18, %v380_v17  ;;  %v385_v24 = vld [vmem:[%s3106_s10 + $0x78] sm:$0xff]  ;;  %v410_v28 = vpack.c.bf16 %v387_v27, %v386_v26  ;;  %v388_v29 = vld [vmem:[%s3106_s10 + $0x90] sm:$0xff] }
  0xb6   : > { %v409_v25 = vpack.c.bf16 %v385_v24, %v384_v23  ;;  %v389_v30 = vld [vmem:[%s3106_s10 + $0x98] sm:$0xff] }
  0xb8   : > { %647 = vmatpush1.bf16.msra.mxu0 %v2565_v31  ;;  %840 = vmatpush1.bf16.msra.mxu1 %v2566_v32  ;;  %v411_v31 = vpack.c.bf16 %v389_v30, %v388_v29  ;;  %v390_v32 = vld [vmem:[%s3106_s10 + $0xa0] sm:$0xff] }
  0xb9   : > { %2214 = vmatprep.subr.bf16.mxu0 %v2567_v35  ;;  %2326 = vmatprep.subr.bf16.mxu1 %v2568_v37  ;;  %v412_v34 = vpack.c.bf16 %v391_v33, %v390_v32  ;;  %v392_v35 = vld [vmem:[%s3106_s10 + $0xb0] sm:$0xff] }
  0xbb   : > { %665 = vmatmul.mubr.bf16.vlgmr.msra.gmra.mrb[0].mxu0 %v402_v36  ;;  %858 = vmatmul.mubr.bf16.vlgmr.msra.gmra.mrb[0].mxu1 %v402_v36  ;;  %v393_v36 = vld [vmem:[%s3106_s10 + $0xb8] sm:$0xff] }
  0xbc   : > { %674 = vmatprep.mubr.bf16.mxu0 %v2833_v0  ;;  %867 = vmatprep.mubr.bf16.mxu1 %v2833_v0  ;;  %v413_v37 = vpack.c.bf16 %v393_v36, %v392_v35 }
  0xbd   : > { %2215 = vmatpush3.bf16.msra.mxu0 %v2569_v38  ;;  %2327 = vmatpush3.bf16.msra.mxu1 %v2570_v39  ;;  %v394_v38 = vld [vmem:[%s3106_s10 + $0xc0] sm:$0xff]  ;;  %v395_v39 = vld [vmem:[%s3106_s10 + $0xc8] sm:$0xff] }
  0xbe   : > { %2216 = vmatprep.subr.bf16.mxu0 %v2571_v42  ;;  %2328 = vmatprep.subr.bf16.mxu1 %v2572_v43  ;;  %v414_v40 = vpack.c.bf16 %v395_v39, %v394_v38  ;;  %v397_v42 = vld [vmem:[%s3106_s10 + $0xd8] sm:$0xff] }
  0xbf   : > { %v415_v43 = vpack.c.bf16 %v397_v42, %v396_v41 }
  0xc1   : > { %2217 = vmatpush3.bf16.msra.mxu0 %v2573_v44  ;;  %2329 = vmatpush3.bf16.msra.mxu1 %v2574_v45  ;;  %v398_v44 = vld [vmem:[%s3106_s10 + $0xe0] sm:$0xff]  ;;  %v399_v45 = vld [vmem:[%s3106_s10 + $0xe8] sm:$0xff] }
  0xc2   : > { %2218 = vmatprep.subr.bf16.mxu0 %v2575_v47  ;;  %2330 = vmatprep.subr.bf16.mxu1 %v2576_v48  ;;  %v400_v47 = vld [vmem:[%s3106_s10 + $0xf0] sm:$0xff]  ;;  %v401_v48 = vld [vmem:[%s3106_s10 + $0xf8] sm:$0xff] }
  0xc3   : > { %675 = vmatmul.mubr.bf16.gmra.mrb[4].mxu0 %v403_v46  ;;  %868 = vmatmul.mubr.bf16.gmra.mrb[4].mxu1 %v403_v46  ;;  %v416_v46 = vpack.c.bf16 %v399_v45, %v398_v44  ;;  %v417_v49 = vpack.c.bf16 %v401_v48, %v400_v47 }
  0xc4   : > { %684 = vmatprep.mubr.bf16.mxu0 %v2833_v0  ;;  %877 = vmatprep.mubr.bf16.mxu1 %v2833_v0 }
  0xc5   : > { %2219 = vmatpush3.bf16.msra.mxu0 %v2577_v51  ;;  %2331 = vmatpush3.bf16.msra.mxu1 %v2578_v52  ;;  %v453_v51 = vshrl.u32 %v452_v50, 7 }
  0xc6   : > { %2220 = vmatprep.subr.bf16.mxu0 %v2579_v53  ;;  %2332 = vmatprep.subr.bf16.mxu1 %v2580_v54  ;;  %v450_v54 = vld [vmem:[%s3553_s2] sm:$0xf] }
  0xc7   : > { %v454_v52 = vsub.s32 0, %v453_v51  ;;  %v462_v53 = vsub.s32 2, %v453_v51 }
  0xc9   : > { %2221 = vmatpush3.bf16.msra.mxu0 %v2581_v55  ;;  %2333 = vmatpush3.bf16.msra.mxu1 %v2582_v57  ;;  %v458_v55 = vsub.s32 1, %v453_v51  ;;  %v3191_v57 = vrot.slane %v450_v54, %v454_v52 }
  0xca   : > { %2222 = vmatprep.subr.bf16.mxu0 %v2583_v58  ;;  %2334 = vmatprep.subr.bf16.mxu1 %v2584_v59  ;;  %v3193_v58 = vrot.slane %v450_v54, %v462_v53 }
  0xcb   : > { %685 = vmatmul.mubr.bf16.gmra.mrb[8].mxu0 %v404_v56  ;;  %878 = vmatmul.mubr.bf16.gmra.mrb[8].mxu1 %v404_v56  ;;  %v466_v56 = vsub.s32 3, %v453_v51 }
  0xcc   : > { %694 = vmatprep.mubr.bf16.mxu0 %v2833_v0  ;;  %887 = vmatprep.mubr.bf16.mxu1 %v2833_v0 }
  0xcd   : > { %2223 = vmatpush3.bf16.msra.mxu0 %v2585_v62  ;;  %2335 = vmatpush3.bf16.msra.mxu1 %v2586_v63  ;;  %v3197_v59 = vrot.slane %v450_v54, %v466_v56 }
  0xce   : > { %2224 = vmatprep.subr.bf16.mxu0 %v2587_v1  ;;  %2336 = vmatprep.subr.bf16.mxu1 %v2588_v2 }
  0xd1   : > { %2225 = vmatpush3.bf16.msra.mxu0 %v2589_v3  ;;  %2337 = vmatpush3.bf16.msra.mxu1 %v2590_v5 }
  0xd2   : > { %2226 = vmatprep.subr.bf16.mxu0 %v2591_v6  ;;  %2338 = vmatprep.subr.bf16.mxu1 %v2592_v7 }
  0xd3   : > { %695 = vmatmul.mubr.bf16.gmra.mrb[12].mxu0 %v405_v4  ;;  %888 = vmatmul.mubr.bf16.gmra.mrb[12].mxu1 %v405_v4 }
  0xd4   : > { %704 = vmatprep.mubr.bf16.mxu0 %v2833_v0  ;;  %897 = vmatprep.mubr.bf16.mxu1 %v2833_v0 }
  0xd5   : > { %2227 = vmatpush3.bf16.msra.mxu0 %v2593_v10  ;;  %2339 = vmatpush3.bf16.msra.mxu1 %v2594_v11 }
  0xd6   : > { %2228 = vmatprep.subr.bf16.mxu0 %v2595_v12  ;;  %2340 = vmatprep.subr.bf16.mxu1 %v2596_v13 }
  0xd9   : > { %2229 = vmatpush3.bf16.msra.mxu0 %v2597_v14  ;;  %2341 = vmatpush3.bf16.msra.mxu1 %v2598_v16 }
  0xdb   : > { %705 = vmatmul.mubr.bf16.gmra.mrb[16].mxu0 %v406_v15  ;;  %898 = vmatmul.mubr.bf16.gmra.mrb[16].mxu1 %v406_v15 }
  0xdc   : > { %714 = vmatprep.mubr.bf16.mxu0 %v2833_v0  ;;  %907 = vmatprep.mubr.bf16.mxu1 %v2833_v0 }
  0xe3   : > { %715 = vmatmul.mubr.bf16.gmra.mrb[20].mxu0 %v407_v19  ;;  %908 = vmatmul.mubr.bf16.gmra.mrb[20].mxu1 %v407_v19 }
  0xe4   : > { %724 = vmatprep.mubr.bf16.mxu0 %v2833_v0  ;;  %917 = vmatprep.mubr.bf16.mxu1 %v2833_v0 }
  0xeb   : > { %725 = vmatmul.mubr.bf16.gmra.mrb[24].mxu0 %v408_v22  ;;  %918 = vmatmul.mubr.bf16.gmra.mrb[24].mxu1 %v408_v22 }
  0xec   : > { %734 = vmatprep.mubr.bf16.mxu0 %v2833_v0  ;;  %927 = vmatprep.mubr.bf16.mxu1 %v2833_v0 }
  0xf3   : > { %735 = vmatmul.mubr.bf16.gmra.mrb[28].mxu0 %v409_v25  ;;  %928 = vmatmul.mubr.bf16.gmra.mrb[28].mxu1 %v409_v25 }
  0xf4   : > { %744 = vmatprep.mubr.bf16.mxu0 %v2833_v0  ;;  %937 = vmatprep.mubr.bf16.mxu1 %v2833_v0 }
  0xfb   : > { %745 = vmatmul.mubr.bf16.gmra.mrb[32].mxu0 %v410_v28  ;;  %938 = vmatmul.mubr.bf16.gmra.mrb[32].mxu1 %v410_v28 }
  0xfc   : > { %754 = vmatprep.mubr.bf16.mxu0 %v2833_v0  ;;  %947 = vmatprep.mubr.bf16.mxu1 %v2833_v0 }
 0x103   : > { %755 = vmatmul.mubr.bf16.gmra.mrb[36].mxu0 %v411_v31  ;;  %948 = vmatmul.mubr.bf16.gmra.mrb[36].mxu1 %v411_v31 }
 0x104   : > { %764 = vmatprep.mubr.bf16.mxu0 %v2833_v0  ;;  %957 = vmatprep.mubr.bf16.mxu1 %v2833_v0 }
 0x10b   : > { %765 = vmatmul.mubr.bf16.gmra.mrb[40].mxu0 %v412_v34  ;;  %958 = vmatmul.mubr.bf16.gmra.mrb[40].mxu1 %v412_v34 }
 0x10c   : > { %774 = vmatprep.mubr.bf16.mxu0 %v2833_v0  ;;  %967 = vmatprep.mubr.bf16.mxu1 %v2833_v0 }
 0x113   : > { %775 = vmatmul.mubr.bf16.gmra.mrb[44].mxu0 %v413_v37  ;;  %968 = vmatmul.mubr.bf16.gmra.mrb[44].mxu1 %v413_v37 }
 0x114   : > { %784 = vmatprep.mubr.bf16.mxu0 %v2833_v0  ;;  %977 = vmatprep.mubr.bf16.mxu1 %v2833_v0 }
 0x11b   : > { %785 = vmatmul.mubr.bf16.gmra.mrb[48].mxu0 %v414_v40  ;;  %978 = vmatmul.mubr.bf16.gmra.mrb[48].mxu1 %v414_v40 }
 0x11c   : > { %794 = vmatprep.mubr.bf16.mxu0 %v2833_v0  ;;  %987 = vmatprep.mubr.bf16.mxu1 %v2833_v0 }
 0x123   : > { %795 = vmatmul.mubr.bf16.gmra.mrb[52].mxu0 %v415_v43  ;;  %988 = vmatmul.mubr.bf16.gmra.mrb[52].mxu1 %v415_v43 }
 0x124   : > { %804 = vmatprep.mubr.bf16.mxu0 %v2833_v0  ;;  %997 = vmatprep.mubr.bf16.mxu1 %v2833_v0 }
 0x12b   : > { %805 = vmatmul.mubr.bf16.gmra.mrb[56].mxu0 %v416_v46  ;;  %998 = vmatmul.mubr.bf16.gmra.mrb[56].mxu1 %v416_v46 }
 0x12c   : > { %814 = vmatprep.mubr.bf16.mxu0 %v2833_v0  ;;  %1007 = vmatprep.mubr.bf16.mxu1 %v2833_v0  ;;  %v3195_v0 = vrot.slane %v450_v54, %v458_v55 }
 0x133   : > { %815 = vmatmul.mubr.bf16.gmra.mrb[60].mxu0 %v417_v49  ;;  %1008 = vmatmul.mubr.bf16.gmra.mrb[60].mxu1 %v417_v49 }
 0x18e   : > { %v666_v60 = vpop.f32.mrb[0].mxu0  ;;  %v859_v61 = vpop.f32.mrb[0].mxu1 }
 0x18f   : > { %v667_v62 = vadd.f32 %v666_v60, %v3191_v57  ;;  %v860_v63 = vadd.f32 %v859_v61, %v3193_v58  ;;  %v668_v1 = vpop.f32.mrb[1].mxu0  ;;  %v861_v2 = vpop.f32.mrb[1].mxu1 }
 0x190   : > { %v669_v3 = vadd.f32 %v668_v1, %v3195_v0  ;;  %v862_v4 = vadd.f32 %v861_v2, %v3197_v59  ;;  %v670_v5 = vpop.f32.mrb[2].mxu0  ;;  %v863_v6 = vpop.f32.mrb[2].mxu1 }
 0x191   : > { %v671_v7 = vadd.f32 %v670_v5, %v3191_v57  ;;  %v864_v8 = vadd.f32 %v863_v6, %v3193_v58  ;;  %v672_v9 = vpop.f32.mrb[3].mxu0  ;;  %v865_v10 = vpop.f32.mrb[3].mxu1  ;;  %v1018_v13 = vmax.f32 %v667_v62, 0.0  ;;  %v1020_v14 = vmax.f32 %v860_v63, 0.0 }
 0x192   : > { %v673_v11 = vadd.f32 %v672_v9, %v3195_v0  ;;  %v866_v12 = vadd.f32 %v865_v10, %v3197_v59  ;;  %v1019_v17 = vmax.f32 %v669_v3, 0.0  ;;  %v1021_v18 = vmax.f32 %v862_v4, 0.0 }
 0x193   : > { %v1022_v15 = vmax.f32 %v671_v7, 0.0  ;;  %v1024_v16 = vmax.f32 %v864_v8, 0.0 }
 0x194   : > { %v1023_v19 = vmax.f32 %v673_v11, 0.0  ;;  %v1025_v20 = vmax.f32 %v866_v12, 0.0 }
 0x195   : > { %v1146_v21 = vpack.c.bf16 %v1022_v15, %v1018_v13  ;;  %v1148_v22 = vpack.c.bf16 %v1024_v16, %v1020_v14 }
 0x196   : > { %v1147_v23 = vpack.c.bf16 %v1023_v19, %v1019_v17  ;;  %v1149_v24 = vpack.c.bf16 %v1025_v20, %v1021_v18  ;;  %v676_v25 = vpop.f32.mrb[4].mxu0  ;;  %v869_v26 = vpop.f32.mrb[4].mxu1 }
 0x197   : > { %v677_v27 = vadd.f32 %v676_v25, %v3191_v57  ;;  %v870_v28 = vadd.f32 %v869_v26, %v3193_v58  ;;  %v678_v29 = vpop.f32.mrb[5].mxu0  ;;  %v871_v30 = vpop.f32.mrb[5].mxu1 }
 0x198   : > { %v679_v31 = vadd.f32 %v678_v29, %v3195_v0  ;;  %v872_v32 = vadd.f32 %v871_v30, %v3197_v59  ;;  %v680_v33 = vpop.f32.mrb[6].mxu0  ;;  %v873_v34 = vpop.f32.mrb[6].mxu1  ;;  %1498 = vmatprep.mubr.bf16.mxu0 %v1147_v23  ;;  %1659 = vmatprep.mubr.bf16.mxu1 %v1149_v24 }
 0x199   : > { %v681_v35 = vadd.f32 %v680_v33, %v3191_v57  ;;  %v874_v36 = vadd.f32 %v873_v34, %v3193_v58  ;;  %v682_v37 = vpop.f32.mrb[7].mxu0  ;;  %v875_v38 = vpop.f32.mrb[7].mxu1  ;;  %1499 = vmatmul.mubr.bf16.vlgmr.msra.gmra.mrb[64].mxu0 %v1146_v21  ;;  %1660 = vmatmul.mubr.bf16.vlgmr.msra.gmra.mrb[64].mxu1 %v1148_v22  ;;  %v1026_v41 = vmax.f32 %v677_v27, 0.0  ;;  %v1028_v42 = vmax.f32 %v870_v28, 0.0 }
 0x19a   : > { %v683_v39 = vadd.f32 %v682_v37, %v3195_v0  ;;  %v876_v40 = vadd.f32 %v875_v38, %v3197_v59  ;;  %v1027_v45 = vmax.f32 %v679_v31, 0.0  ;;  %v1029_v46 = vmax.f32 %v872_v32, 0.0 }
 0x19b   : > { %v1030_v43 = vmax.f32 %v681_v35, 0.0  ;;  %v1032_v44 = vmax.f32 %v874_v36, 0.0 }
 0x19c   : > { %v1031_v47 = vmax.f32 %v683_v39, 0.0  ;;  %v1033_v48 = vmax.f32 %v876_v40, 0.0 }
 0x19d   : > { %v1150_v49 = vpack.c.bf16 %v1030_v43, %v1026_v41  ;;  %v1152_v50 = vpack.c.bf16 %v1032_v44, %v1028_v42 }
 0x19e   : > { %v1151_v51 = vpack.c.bf16 %v1031_v47, %v1027_v45  ;;  %v1153_v52 = vpack.c.bf16 %v1033_v48, %v1029_v46  ;;  %v686_v53 = vpop.f32.mrb[8].mxu0  ;;  %v879_v54 = vpop.f32.mrb[8].mxu1 }
 0x19f   : > { %v687_v55 = vadd.f32 %v686_v53, %v3191_v57  ;;  %v880_v56 = vadd.f32 %v879_v54, %v3193_v58  ;;  %v688_v60 = vpop.f32.mrb[9].mxu0  ;;  %v881_v61 = vpop.f32.mrb[9].mxu1 }
 0x1a0   : > { %v689_v62 = vadd.f32 %v688_v60, %v3195_v0  ;;  %v882_v63 = vadd.f32 %v881_v61, %v3197_v59  ;;  %v690_v1 = vpop.f32.mrb[10].mxu0  ;;  %v883_v2 = vpop.f32.mrb[10].mxu1  ;;  %1506 = vmatprep.mubr.bf16.mxu0 %v1151_v51  ;;  %1667 = vmatprep.mubr.bf16.mxu1 %v1153_v52 }
 0x1a1   : > { %v691_v3 = vadd.f32 %v690_v1, %v3191_v57  ;;  %v884_v4 = vadd.f32 %v883_v2, %v3193_v58  ;;  %v692_v5 = vpop.f32.mrb[11].mxu0  ;;  %v885_v6 = vpop.f32.mrb[11].mxu1  ;;  %1507 = vmatmul.mubr.bf16.gmra.mrb[68].mxu0 %v1150_v49  ;;  %1668 = vmatmul.mubr.bf16.gmra.mrb[68].mxu1 %v1152_v50  ;;  %v1034_v9 = vmax.f32 %v687_v55, 0.0  ;;  %v1036_v10 = vmax.f32 %v880_v56, 0.0 }
 0x1a2   : > { %v693_v7 = vadd.f32 %v692_v5, %v3195_v0  ;;  %v886_v8 = vadd.f32 %v885_v6, %v3197_v59  ;;  %v1035_v13 = vmax.f32 %v689_v62, 0.0  ;;  %v1037_v14 = vmax.f32 %v882_v63, 0.0 }
 0x1a3   : > { %v1038_v11 = vmax.f32 %v691_v3, 0.0  ;;  %v1040_v12 = vmax.f32 %v884_v4, 0.0 }
 0x1a4   : > { %v1039_v15 = vmax.f32 %v693_v7, 0.0  ;;  %v1041_v16 = vmax.f32 %v886_v8, 0.0 }
 0x1a5   : > { %v1154_v17 = vpack.c.bf16 %v1038_v11, %v1034_v9  ;;  %v1156_v18 = vpack.c.bf16 %v1040_v12, %v1036_v10 }
 0x1a6   : > { %v1155_v19 = vpack.c.bf16 %v1039_v15, %v1035_v13  ;;  %v1157_v20 = vpack.c.bf16 %v1041_v16, %v1037_v14  ;;  %v696_v21 = vpop.f32.mrb[12].mxu0  ;;  %v889_v22 = vpop.f32.mrb[12].mxu1 }
 0x1a7   : > { %v697_v23 = vadd.f32 %v696_v21, %v3191_v57  ;;  %v890_v24 = vadd.f32 %v889_v22, %v3193_v58  ;;  %v698_v25 = vpop.f32.mrb[13].mxu0  ;;  %v891_v26 = vpop.f32.mrb[13].mxu1 }
 0x1a8   : > { %v699_v27 = vadd.f32 %v698_v25, %v3195_v0  ;;  %v892_v28 = vadd.f32 %v891_v26, %v3197_v59  ;;  %v700_v29 = vpop.f32.mrb[14].mxu0  ;;  %v893_v30 = vpop.f32.mrb[14].mxu1  ;;  %1514 = vmatprep.mubr.bf16.mxu0 %v1155_v19  ;;  %1675 = vmatprep.mubr.bf16.mxu1 %v1157_v20 }
 0x1a9   : > { %v701_v31 = vadd.f32 %v700_v29, %v3191_v57  ;;  %v894_v32 = vadd.f32 %v893_v30, %v3193_v58  ;;  %v702_v33 = vpop.f32.mrb[15].mxu0  ;;  %v895_v34 = vpop.f32.mrb[15].mxu1  ;;  %1515 = vmatmul.mubr.bf16.gmra.mrb[72].mxu0 %v1154_v17  ;;  %1676 = vmatmul.mubr.bf16.gmra.mrb[72].mxu1 %v1156_v18  ;;  %v1042_v37 = vmax.f32 %v697_v23, 0.0  ;;  %v1044_v38 = vmax.f32 %v890_v24, 0.0 }
 0x1aa   : > { %v703_v35 = vadd.f32 %v702_v33, %v3195_v0  ;;  %v896_v36 = vadd.f32 %v895_v34, %v3197_v59  ;;  %v1043_v41 = vmax.f32 %v699_v27, 0.0  ;;  %v1045_v42 = vmax.f32 %v892_v28, 0.0 }
 0x1ab   : > { %v1046_v39 = vmax.f32 %v701_v31, 0.0  ;;  %v1048_v40 = vmax.f32 %v894_v32, 0.0 }
 0x1ac   : > { %v1047_v43 = vmax.f32 %v703_v35, 0.0  ;;  %v1049_v44 = vmax.f32 %v896_v36, 0.0 }
 0x1ad   : > { %v1158_v45 = vpack.c.bf16 %v1046_v39, %v1042_v37  ;;  %v1160_v46 = vpack.c.bf16 %v1048_v40, %v1044_v38 }
 0x1ae   : > { %v1159_v47 = vpack.c.bf16 %v1047_v43, %v1043_v41  ;;  %v1161_v48 = vpack.c.bf16 %v1049_v44, %v1045_v42  ;;  %v706_v49 = vpop.f32.mrb[16].mxu0  ;;  %v899_v50 = vpop.f32.mrb[16].mxu1 }
 0x1af   : > { %v707_v51 = vadd.f32 %v706_v49, %v3191_v57  ;;  %v900_v52 = vadd.f32 %v899_v50, %v3193_v58  ;;  %v708_v53 = vpop.f32.mrb[17].mxu0  ;;  %v901_v54 = vpop.f32.mrb[17].mxu1 }
 0x1b0   : > { %v709_v55 = vadd.f32 %v708_v53, %v3195_v0  ;;  %v902_v56 = vadd.f32 %v901_v54, %v3197_v59  ;;  %v710_v60 = vpop.f32.mrb[18].mxu0  ;;  %v903_v61 = vpop.f32.mrb[18].mxu1  ;;  %1522 = vmatprep.mubr.bf16.mxu0 %v1159_v47  ;;  %1683 = vmatprep.mubr.bf16.mxu1 %v1161_v48 }
 0x1b1   : > { %v711_v62 = vadd.f32 %v710_v60, %v3191_v57  ;;  %v904_v63 = vadd.f32 %v903_v61, %v3193_v58  ;;  %v712_v1 = vpop.f32.mrb[19].mxu0  ;;  %v905_v2 = vpop.f32.mrb[19].mxu1  ;;  %1523 = vmatmul.mubr.bf16.gmra.mrb[76].mxu0 %v1158_v45  ;;  %1684 = vmatmul.mubr.bf16.gmra.mrb[76].mxu1 %v1160_v46  ;;  %v1050_v5 = vmax.f32 %v707_v51, 0.0  ;;  %v1052_v6 = vmax.f32 %v900_v52, 0.0 }
 0x1b2   : > { %v713_v3 = vadd.f32 %v712_v1, %v3195_v0  ;;  %v906_v4 = vadd.f32 %v905_v2, %v3197_v59  ;;  %v1051_v9 = vmax.f32 %v709_v55, 0.0  ;;  %v1053_v10 = vmax.f32 %v902_v56, 0.0 }
 0x1b3   : > { %v1054_v7 = vmax.f32 %v711_v62, 0.0  ;;  %v1056_v8 = vmax.f32 %v904_v63, 0.0 }
 0x1b4   : > { %v1055_v11 = vmax.f32 %v713_v3, 0.0  ;;  %v1057_v12 = vmax.f32 %v906_v4, 0.0 }
 0x1b5   : > { %v1162_v13 = vpack.c.bf16 %v1054_v7, %v1050_v5  ;;  %v1164_v14 = vpack.c.bf16 %v1056_v8, %v1052_v6 }
 0x1b6   : > { %v1163_v15 = vpack.c.bf16 %v1055_v11, %v1051_v9  ;;  %v1165_v16 = vpack.c.bf16 %v1057_v12, %v1053_v10  ;;  %v716_v17 = vpop.f32.mrb[20].mxu0  ;;  %v909_v18 = vpop.f32.mrb[20].mxu1 }
 0x1b7   : > { %v717_v19 = vadd.f32 %v716_v17, %v3191_v57  ;;  %v910_v20 = vadd.f32 %v909_v18, %v3193_v58  ;;  %v718_v21 = vpop.f32.mrb[21].mxu0  ;;  %v911_v22 = vpop.f32.mrb[21].mxu1 }
 0x1b8   : > { %v719_v23 = vadd.f32 %v718_v21, %v3195_v0  ;;  %v912_v24 = vadd.f32 %v911_v22, %v3197_v59  ;;  %v720_v25 = vpop.f32.mrb[22].mxu0  ;;  %v913_v26 = vpop.f32.mrb[22].mxu1  ;;  %1530 = vmatprep.mubr.bf16.mxu0 %v1163_v15  ;;  %1691 = vmatprep.mubr.bf16.mxu1 %v1165_v16 }
 0x1b9   : > { %v721_v27 = vadd.f32 %v720_v25, %v3191_v57  ;;  %v914_v28 = vadd.f32 %v913_v26, %v3193_v58  ;;  %v722_v29 = vpop.f32.mrb[23].mxu0  ;;  %v915_v30 = vpop.f32.mrb[23].mxu1  ;;  %1531 = vmatmul.mubr.bf16.gmra.mrb[80].mxu0 %v1162_v13  ;;  %1692 = vmatmul.mubr.bf16.gmra.mrb[80].mxu1 %v1164_v14  ;;  %v1058_v33 = vmax.f32 %v717_v19, 0.0  ;;  %v1060_v34 = vmax.f32 %v910_v20, 0.0 }
 0x1ba   : > { %v723_v31 = vadd.f32 %v722_v29, %v3195_v0  ;;  %v916_v32 = vadd.f32 %v915_v30, %v3197_v59  ;;  %v1059_v37 = vmax.f32 %v719_v23, 0.0  ;;  %v1061_v38 = vmax.f32 %v912_v24, 0.0 }
 0x1bb   : > { %v1062_v35 = vmax.f32 %v721_v27, 0.0  ;;  %v1064_v36 = vmax.f32 %v914_v28, 0.0 }
 0x1bc   : > { %v1063_v39 = vmax.f32 %v723_v31, 0.0  ;;  %v1065_v40 = vmax.f32 %v916_v32, 0.0 }
 0x1bd   : > { %v1166_v41 = vpack.c.bf16 %v1062_v35, %v1058_v33  ;;  %v1168_v42 = vpack.c.bf16 %v1064_v36, %v1060_v34 }
 0x1be   : > { %v1167_v43 = vpack.c.bf16 %v1063_v39, %v1059_v37  ;;  %v1169_v44 = vpack.c.bf16 %v1065_v40, %v1061_v38  ;;  %v726_v45 = vpop.f32.mrb[24].mxu0  ;;  %v919_v46 = vpop.f32.mrb[24].mxu1 }
 0x1bf   : > { %v727_v47 = vadd.f32 %v726_v45, %v3191_v57  ;;  %v920_v48 = vadd.f32 %v919_v46, %v3193_v58  ;;  %v728_v49 = vpop.f32.mrb[25].mxu0  ;;  %v921_v50 = vpop.f32.mrb[25].mxu1 }
 0x1c0   : > { %v729_v51 = vadd.f32 %v728_v49, %v3195_v0  ;;  %v922_v52 = vadd.f32 %v921_v50, %v3197_v59  ;;  %v730_v53 = vpop.f32.mrb[26].mxu0  ;;  %v923_v54 = vpop.f32.mrb[26].mxu1  ;;  %1538 = vmatprep.mubr.bf16.mxu0 %v1167_v43  ;;  %1699 = vmatprep.mubr.bf16.mxu1 %v1169_v44 }
 0x1c1   : > { %v731_v55 = vadd.f32 %v730_v53, %v3191_v57  ;;  %v924_v56 = vadd.f32 %v923_v54, %v3193_v58  ;;  %v732_v60 = vpop.f32.mrb[27].mxu0  ;;  %v925_v61 = vpop.f32.mrb[27].mxu1  ;;  %1539 = vmatmul.mubr.bf16.gmra.mrb[84].mxu0 %v1166_v41  ;;  %1700 = vmatmul.mubr.bf16.gmra.mrb[84].mxu1 %v1168_v42  ;;  %v1066_v1 = vmax.f32 %v727_v47, 0.0  ;;  %v1068_v2 = vmax.f32 %v920_v48, 0.0 }
 0x1c2   : > { %v733_v62 = vadd.f32 %v732_v60, %v3195_v0  ;;  %v926_v63 = vadd.f32 %v925_v61, %v3197_v59  ;;  %v1067_v5 = vmax.f32 %v729_v51, 0.0  ;;  %v1069_v6 = vmax.f32 %v922_v52, 0.0 }
 0x1c3   : > { %v1070_v3 = vmax.f32 %v731_v55, 0.0  ;;  %v1072_v4 = vmax.f32 %v924_v56, 0.0 }
 0x1c4   : > { %v1071_v7 = vmax.f32 %v733_v62, 0.0  ;;  %v1073_v8 = vmax.f32 %v926_v63, 0.0 }
 0x1c5   : > { %v1170_v9 = vpack.c.bf16 %v1070_v3, %v1066_v1  ;;  %v1172_v10 = vpack.c.bf16 %v1072_v4, %v1068_v2 }
 0x1c6   : > { %v1171_v11 = vpack.c.bf16 %v1071_v7, %v1067_v5  ;;  %v1173_v12 = vpack.c.bf16 %v1073_v8, %v1069_v6  ;;  %v736_v13 = vpop.f32.mrb[28].mxu0  ;;  %v929_v14 = vpop.f32.mrb[28].mxu1 }
 0x1c7   : > { %v737_v15 = vadd.f32 %v736_v13, %v3191_v57  ;;  %v930_v16 = vadd.f32 %v929_v14, %v3193_v58  ;;  %v738_v17 = vpop.f32.mrb[29].mxu0  ;;  %v931_v18 = vpop.f32.mrb[29].mxu1 }
 0x1c8   : > { %v739_v19 = vadd.f32 %v738_v17, %v3195_v0  ;;  %v932_v20 = vadd.f32 %v931_v18, %v3197_v59  ;;  %v740_v21 = vpop.f32.mrb[30].mxu0  ;;  %v933_v22 = vpop.f32.mrb[30].mxu1  ;;  %1546 = vmatprep.mubr.bf16.mxu0 %v1171_v11  ;;  %1707 = vmatprep.mubr.bf16.mxu1 %v1173_v12 }
 0x1c9   : > { %v741_v23 = vadd.f32 %v740_v21, %v3191_v57  ;;  %v934_v24 = vadd.f32 %v933_v22, %v3193_v58  ;;  %v742_v25 = vpop.f32.mrb[31].mxu0  ;;  %v935_v26 = vpop.f32.mrb[31].mxu1  ;;  %1547 = vmatmul.mubr.bf16.gmra.mrb[88].mxu0 %v1170_v9  ;;  %1708 = vmatmul.mubr.bf16.gmra.mrb[88].mxu1 %v1172_v10  ;;  %v1074_v29 = vmax.f32 %v737_v15, 0.0  ;;  %v1076_v30 = vmax.f32 %v930_v16, 0.0 }
 0x1ca   : > { %v743_v27 = vadd.f32 %v742_v25, %v3195_v0  ;;  %v936_v28 = vadd.f32 %v935_v26, %v3197_v59  ;;  %v1075_v33 = vmax.f32 %v739_v19, 0.0  ;;  %v1077_v34 = vmax.f32 %v932_v20, 0.0 }
 0x1cb   : > { %v1078_v31 = vmax.f32 %v741_v23, 0.0  ;;  %v1080_v32 = vmax.f32 %v934_v24, 0.0 }
 0x1cc   : > { %v1079_v35 = vmax.f32 %v743_v27, 0.0  ;;  %v1081_v36 = vmax.f32 %v936_v28, 0.0 }
 0x1cd   : > { %v1174_v37 = vpack.c.bf16 %v1078_v31, %v1074_v29  ;;  %v1176_v38 = vpack.c.bf16 %v1080_v32, %v1076_v30 }
 0x1ce   : > { %v1175_v39 = vpack.c.bf16 %v1079_v35, %v1075_v33  ;;  %v1177_v40 = vpack.c.bf16 %v1081_v36, %v1077_v34  ;;  %v746_v41 = vpop.f32.mrb[32].mxu0  ;;  %v939_v42 = vpop.f32.mrb[32].mxu1 }
 0x1cf   : > { %v747_v43 = vadd.f32 %v746_v41, %v3191_v57  ;;  %v940_v44 = vadd.f32 %v939_v42, %v3193_v58  ;;  %v748_v45 = vpop.f32.mrb[33].mxu0  ;;  %v941_v46 = vpop.f32.mrb[33].mxu1 }
 0x1d0   : > { %v749_v47 = vadd.f32 %v748_v45, %v3195_v0  ;;  %v942_v48 = vadd.f32 %v941_v46, %v3197_v59  ;;  %v750_v49 = vpop.f32.mrb[34].mxu0  ;;  %v943_v50 = vpop.f32.mrb[34].mxu1  ;;  %1554 = vmatprep.mubr.bf16.mxu0 %v1175_v39  ;;  %1715 = vmatprep.mubr.bf16.mxu1 %v1177_v40 }
 0x1d1   : > { %v751_v51 = vadd.f32 %v750_v49, %v3191_v57  ;;  %v944_v52 = vadd.f32 %v943_v50, %v3193_v58  ;;  %v752_v53 = vpop.f32.mrb[35].mxu0  ;;  %v945_v54 = vpop.f32.mrb[35].mxu1  ;;  %1555 = vmatmul.mubr.bf16.gmra.mrb[92].mxu0 %v1174_v37  ;;  %1716 = vmatmul.mubr.bf16.gmra.mrb[92].mxu1 %v1176_v38  ;;  %v1082_v60 = vmax.f32 %v747_v43, 0.0  ;;  %v1084_v61 = vmax.f32 %v940_v44, 0.0 }
 0x1d2   : > { %v753_v55 = vadd.f32 %v752_v53, %v3195_v0  ;;  %v946_v56 = vadd.f32 %v945_v54, %v3197_v59  ;;  %v1083_v1 = vmax.f32 %v749_v47, 0.0  ;;  %v1085_v2 = vmax.f32 %v942_v48, 0.0 }
 0x1d3   : > { %v1086_v62 = vmax.f32 %v751_v51, 0.0  ;;  %v1088_v63 = vmax.f32 %v944_v52, 0.0 }
 0x1d4   : > { %v1087_v3 = vmax.f32 %v753_v55, 0.0  ;;  %v1089_v4 = vmax.f32 %v946_v56, 0.0 }
 0x1d5   : > { %v1178_v5 = vpack.c.bf16 %v1086_v62, %v1082_v60  ;;  %v1180_v6 = vpack.c.bf16 %v1088_v63, %v1084_v61 }
 0x1d6   : > { %v1179_v7 = vpack.c.bf16 %v1087_v3, %v1083_v1  ;;  %v1181_v8 = vpack.c.bf16 %v1089_v4, %v1085_v2  ;;  %v756_v9 = vpop.f32.mrb[36].mxu0  ;;  %v949_v10 = vpop.f32.mrb[36].mxu1 }
 0x1d7   : > { %v757_v11 = vadd.f32 %v756_v9, %v3191_v57  ;;  %v950_v12 = vadd.f32 %v949_v10, %v3193_v58  ;;  %v758_v13 = vpop.f32.mrb[37].mxu0  ;;  %v951_v14 = vpop.f32.mrb[37].mxu1 }
 0x1d8   : > { %v759_v15 = vadd.f32 %v758_v13, %v3195_v0  ;;  %v952_v16 = vadd.f32 %v951_v14, %v3197_v59  ;;  %v760_v17 = vpop.f32.mrb[38].mxu0  ;;  %v953_v18 = vpop.f32.mrb[38].mxu1  ;;  %1562 = vmatprep.mubr.bf16.mxu0 %v1179_v7  ;;  %1723 = vmatprep.mubr.bf16.mxu1 %v1181_v8 }
 0x1d9   : > { %v761_v19 = vadd.f32 %v760_v17, %v3191_v57  ;;  %v954_v20 = vadd.f32 %v953_v18, %v3193_v58  ;;  %v762_v21 = vpop.f32.mrb[39].mxu0  ;;  %v955_v22 = vpop.f32.mrb[39].mxu1  ;;  %1563 = vmatmul.mubr.bf16.gmra.mrb[96].mxu0 %v1178_v5  ;;  %1724 = vmatmul.mubr.bf16.gmra.mrb[96].mxu1 %v1180_v6  ;;  %v1090_v25 = vmax.f32 %v757_v11, 0.0  ;;  %v1092_v26 = vmax.f32 %v950_v12, 0.0 }
 0x1da   : > { %v763_v23 = vadd.f32 %v762_v21, %v3195_v0  ;;  %v956_v24 = vadd.f32 %v955_v22, %v3197_v59  ;;  %v1091_v29 = vmax.f32 %v759_v15, 0.0  ;;  %v1093_v30 = vmax.f32 %v952_v16, 0.0 }
 0x1db   : > { %v1094_v27 = vmax.f32 %v761_v19, 0.0  ;;  %v1096_v28 = vmax.f32 %v954_v20, 0.0 }
 0x1dc   : > { %v1095_v31 = vmax.f32 %v763_v23, 0.0  ;;  %v1097_v32 = vmax.f32 %v956_v24, 0.0 }
 0x1dd   : > { %v1182_v33 = vpack.c.bf16 %v1094_v27, %v1090_v25  ;;  %v1184_v34 = vpack.c.bf16 %v1096_v28, %v1092_v26 }
 0x1de   : > { %v1183_v35 = vpack.c.bf16 %v1095_v31, %v1091_v29  ;;  %v1185_v36 = vpack.c.bf16 %v1097_v32, %v1093_v30  ;;  %v766_v37 = vpop.f32.mrb[40].mxu0  ;;  %v959_v38 = vpop.f32.mrb[40].mxu1 }
 0x1df   : > { %v767_v39 = vadd.f32 %v766_v37, %v3191_v57  ;;  %v960_v40 = vadd.f32 %v959_v38, %v3193_v58  ;;  %v768_v41 = vpop.f32.mrb[41].mxu0  ;;  %v961_v42 = vpop.f32.mrb[41].mxu1 }
 0x1e0   : > { %v769_v43 = vadd.f32 %v768_v41, %v3195_v0  ;;  %v962_v44 = vadd.f32 %v961_v42, %v3197_v59  ;;  %v770_v45 = vpop.f32.mrb[42].mxu0  ;;  %v963_v46 = vpop.f32.mrb[42].mxu1  ;;  %1570 = vmatprep.mubr.bf16.mxu0 %v1183_v35  ;;  %1731 = vmatprep.mubr.bf16.mxu1 %v1185_v36 }
 0x1e1   : > { %v771_v47 = vadd.f32 %v770_v45, %v3191_v57  ;;  %v964_v48 = vadd.f32 %v963_v46, %v3193_v58  ;;  %v772_v49 = vpop.f32.mrb[43].mxu0  ;;  %v965_v50 = vpop.f32.mrb[43].mxu1  ;;  %1571 = vmatmul.mubr.bf16.gmra.mrb[100].mxu0 %v1182_v33  ;;  %1732 = vmatmul.mubr.bf16.gmra.mrb[100].mxu1 %v1184_v34  ;;  %v1098_v53 = vmax.f32 %v767_v39, 0.0  ;;  %v1100_v54 = vmax.f32 %v960_v40, 0.0 }
 0x1e2   : > { %v773_v51 = vadd.f32 %v772_v49, %v3195_v0  ;;  %v966_v52 = vadd.f32 %v965_v50, %v3197_v59  ;;  %v1099_v60 = vmax.f32 %v769_v43, 0.0  ;;  %v1101_v61 = vmax.f32 %v962_v44, 0.0 }
 0x1e3   : > { %v1102_v55 = vmax.f32 %v771_v47, 0.0  ;;  %v1104_v56 = vmax.f32 %v964_v48, 0.0 }
 0x1e4   : > { %v1103_v62 = vmax.f32 %v773_v51, 0.0  ;;  %v1105_v63 = vmax.f32 %v966_v52, 0.0 }
 0x1e5   : > { %v1186_v1 = vpack.c.bf16 %v1102_v55, %v1098_v53  ;;  %v1188_v2 = vpack.c.bf16 %v1104_v56, %v1100_v54 }
 0x1e6   : > { %v1187_v3 = vpack.c.bf16 %v1103_v62, %v1099_v60  ;;  %v1189_v4 = vpack.c.bf16 %v1105_v63, %v1101_v61  ;;  %v776_v5 = vpop.f32.mrb[44].mxu0  ;;  %v969_v6 = vpop.f32.mrb[44].mxu1 }
 0x1e7   : > { %v777_v7 = vadd.f32 %v776_v5, %v3191_v57  ;;  %v970_v8 = vadd.f32 %v969_v6, %v3193_v58  ;;  %v778_v9 = vpop.f32.mrb[45].mxu0  ;;  %v971_v10 = vpop.f32.mrb[45].mxu1 }
 0x1e8   : > { %v779_v11 = vadd.f32 %v778_v9, %v3195_v0  ;;  %v972_v12 = vadd.f32 %v971_v10, %v3197_v59  ;;  %v780_v13 = vpop.f32.mrb[46].mxu0  ;;  %v973_v14 = vpop.f32.mrb[46].mxu1  ;;  %1578 = vmatprep.mubr.bf16.mxu0 %v1187_v3  ;;  %1739 = vmatprep.mubr.bf16.mxu1 %v1189_v4 }
 0x1e9   : > { %v781_v15 = vadd.f32 %v780_v13, %v3191_v57  ;;  %v974_v16 = vadd.f32 %v973_v14, %v3193_v58  ;;  %v782_v17 = vpop.f32.mrb[47].mxu0  ;;  %v975_v18 = vpop.f32.mrb[47].mxu1  ;;  %1579 = vmatmul.mubr.bf16.gmra.mrb[104].mxu0 %v1186_v1  ;;  %1740 = vmatmul.mubr.bf16.gmra.mrb[104].mxu1 %v1188_v2  ;;  %v1106_v21 = vmax.f32 %v777_v7, 0.0  ;;  %v1108_v22 = vmax.f32 %v970_v8, 0.0 }
 0x1ea   : > { %v783_v19 = vadd.f32 %v782_v17, %v3195_v0  ;;  %v976_v20 = vadd.f32 %v975_v18, %v3197_v59  ;;  %v1107_v25 = vmax.f32 %v779_v11, 0.0  ;;  %v1109_v26 = vmax.f32 %v972_v12, 0.0 }
 0x1eb   : > { %v1110_v23 = vmax.f32 %v781_v15, 0.0  ;;  %v1112_v24 = vmax.f32 %v974_v16, 0.0 }
 0x1ec   : > { %v1111_v27 = vmax.f32 %v783_v19, 0.0  ;;  %v1113_v28 = vmax.f32 %v976_v20, 0.0 }
 0x1ed   : > { %v1190_v29 = vpack.c.bf16 %v1110_v23, %v1106_v21  ;;  %v1192_v30 = vpack.c.bf16 %v1112_v24, %v1108_v22 }
 0x1ee   : > { %v1191_v31 = vpack.c.bf16 %v1111_v27, %v1107_v25  ;;  %v1193_v32 = vpack.c.bf16 %v1113_v28, %v1109_v26  ;;  %v786_v33 = vpop.f32.mrb[48].mxu0  ;;  %v979_v34 = vpop.f32.mrb[48].mxu1 }
 0x1ef   : > { %v787_v35 = vadd.f32 %v786_v33, %v3191_v57  ;;  %v980_v36 = vadd.f32 %v979_v34, %v3193_v58  ;;  %v788_v37 = vpop.f32.mrb[49].mxu0  ;;  %v981_v38 = vpop.f32.mrb[49].mxu1 }
 0x1f0   : > { %v789_v39 = vadd.f32 %v788_v37, %v3195_v0  ;;  %v982_v40 = vadd.f32 %v981_v38, %v3197_v59  ;;  %v790_v41 = vpop.f32.mrb[50].mxu0  ;;  %v983_v42 = vpop.f32.mrb[50].mxu1  ;;  %1586 = vmatprep.mubr.bf16.mxu0 %v1191_v31  ;;  %1747 = vmatprep.mubr.bf16.mxu1 %v1193_v32 }
 0x1f1   : > { %v791_v43 = vadd.f32 %v790_v41, %v3191_v57  ;;  %v984_v44 = vadd.f32 %v983_v42, %v3193_v58  ;;  %v792_v45 = vpop.f32.mrb[51].mxu0  ;;  %v985_v46 = vpop.f32.mrb[51].mxu1  ;;  %1587 = vmatmul.mubr.bf16.gmra.mrb[108].mxu0 %v1190_v29  ;;  %1748 = vmatmul.mubr.bf16.gmra.mrb[108].mxu1 %v1192_v30  ;;  %v1114_v49 = vmax.f32 %v787_v35, 0.0  ;;  %v1116_v50 = vmax.f32 %v980_v36, 0.0 }
 0x1f2   : > { %v793_v47 = vadd.f32 %v792_v45, %v3195_v0  ;;  %v986_v48 = vadd.f32 %v985_v46, %v3197_v59  ;;  %v1115_v53 = vmax.f32 %v789_v39, 0.0  ;;  %v1117_v54 = vmax.f32 %v982_v40, 0.0 }
 0x1f3   : > { %v1118_v51 = vmax.f32 %v791_v43, 0.0  ;;  %v1120_v52 = vmax.f32 %v984_v44, 0.0 }
 0x1f4   : > { %v1119_v55 = vmax.f32 %v793_v47, 0.0  ;;  %v1121_v56 = vmax.f32 %v986_v48, 0.0 }
 0x1f5   : > { %v1194_v60 = vpack.c.bf16 %v1118_v51, %v1114_v49  ;;  %v1196_v61 = vpack.c.bf16 %v1120_v52, %v1116_v50 }
 0x1f6   : > { %v1195_v62 = vpack.c.bf16 %v1119_v55, %v1115_v53  ;;  %v1197_v63 = vpack.c.bf16 %v1121_v56, %v1117_v54  ;;  %v796_v1 = vpop.f32.mrb[52].mxu0  ;;  %v989_v2 = vpop.f32.mrb[52].mxu1 }
 0x1f7   : > { %v797_v3 = vadd.f32 %v796_v1, %v3191_v57  ;;  %v990_v4 = vadd.f32 %v989_v2, %v3193_v58  ;;  %v798_v5 = vpop.f32.mrb[53].mxu0  ;;  %v991_v6 = vpop.f32.mrb[53].mxu1 }
 0x1f8   : > { %v799_v7 = vadd.f32 %v798_v5, %v3195_v0  ;;  %v992_v8 = vadd.f32 %v991_v6, %v3197_v59  ;;  %v800_v9 = vpop.f32.mrb[54].mxu0  ;;  %v993_v10 = vpop.f32.mrb[54].mxu1  ;;  %1594 = vmatprep.mubr.bf16.mxu0 %v1195_v62  ;;  %1755 = vmatprep.mubr.bf16.mxu1 %v1197_v63 }
 0x1f9   : > { %v801_v11 = vadd.f32 %v800_v9, %v3191_v57  ;;  %v994_v12 = vadd.f32 %v993_v10, %v3193_v58  ;;  %v802_v13 = vpop.f32.mrb[55].mxu0  ;;  %v995_v14 = vpop.f32.mrb[55].mxu1  ;;  %1595 = vmatmul.mubr.bf16.gmra.mrb[112].mxu0 %v1194_v60  ;;  %1756 = vmatmul.mubr.bf16.gmra.mrb[112].mxu1 %v1196_v61  ;;  %v1122_v17 = vmax.f32 %v797_v3, 0.0  ;;  %v1124_v18 = vmax.f32 %v990_v4, 0.0 }
 0x1fa   : > { %v803_v15 = vadd.f32 %v802_v13, %v3195_v0  ;;  %v996_v16 = vadd.f32 %v995_v14, %v3197_v59  ;;  %v1123_v21 = vmax.f32 %v799_v7, 0.0  ;;  %v1125_v22 = vmax.f32 %v992_v8, 0.0 }
 0x1fb   : > { %v1126_v19 = vmax.f32 %v801_v11, 0.0  ;;  %v1128_v20 = vmax.f32 %v994_v12, 0.0 }
 0x1fc   : > { %v1127_v23 = vmax.f32 %v803_v15, 0.0  ;;  %v1129_v24 = vmax.f32 %v996_v16, 0.0 }
 0x1fd   : > { %v1198_v25 = vpack.c.bf16 %v1126_v19, %v1122_v17  ;;  %v1200_v26 = vpack.c.bf16 %v1128_v20, %v1124_v18 }
 0x1fe   : > { %v1199_v27 = vpack.c.bf16 %v1127_v23, %v1123_v21  ;;  %v1201_v28 = vpack.c.bf16 %v1129_v24, %v1125_v22  ;;  %v806_v29 = vpop.f32.mrb[56].mxu0  ;;  %v999_v30 = vpop.f32.mrb[56].mxu1 }
 0x1ff   : > { %v807_v31 = vadd.f32 %v806_v29, %v3191_v57  ;;  %v1000_v32 = vadd.f32 %v999_v30, %v3193_v58  ;;  %v808_v33 = vpop.f32.mrb[57].mxu0  ;;  %v1001_v34 = vpop.f32.mrb[57].mxu1 }
 0x200   : > { %v809_v35 = vadd.f32 %v808_v33, %v3195_v0  ;;  %v1002_v36 = vadd.f32 %v1001_v34, %v3197_v59  ;;  %v810_v37 = vpop.f32.mrb[58].mxu0  ;;  %v1003_v38 = vpop.f32.mrb[58].mxu1  ;;  %1602 = vmatprep.mubr.bf16.mxu0 %v1199_v27  ;;  %1763 = vmatprep.mubr.bf16.mxu1 %v1201_v28  ;;  %v3330_v34 = vld [vmem:[%s3555_s4] ss:$0 sm:$0xff] }
 0x201   : > { %v811_v39 = vadd.f32 %v810_v37, %v3191_v57  ;;  %v1004_v40 = vadd.f32 %v1003_v38, %v3193_v58  ;;  %v812_v41 = vpop.f32.mrb[59].mxu0  ;;  %v1005_v42 = vpop.f32.mrb[59].mxu1  ;;  %1603 = vmatmul.mubr.bf16.gmra.mrb[116].mxu0 %v1198_v25  ;;  %1764 = vmatmul.mubr.bf16.gmra.mrb[116].mxu1 %v1200_v26  ;;  %v1130_v45 = vmax.f32 %v807_v31, 0.0  ;;  %v1132_v46 = vmax.f32 %v1000_v32, 0.0  ;;  %v3336_v38 = vld [vmem:[%s3556_s5] ss:$0 sm:$0xff] }
 0x202   : > { %v813_v43 = vadd.f32 %v812_v41, %v3195_v0  ;;  %v1006_v44 = vadd.f32 %v1005_v42, %v3197_v59  ;;  %v1131_v49 = vmax.f32 %v809_v35, 0.0  ;;  %v1133_v50 = vmax.f32 %v1002_v36, 0.0  ;;  %v2599_v35 = vld [vmem:[%s3106_s10] sm:$0xff] }
 0x203   : > { %v1134_v47 = vmax.f32 %v811_v39, 0.0  ;;  %v1136_v48 = vmax.f32 %v1004_v40, 0.0  ;;  %v2600_v40 = vld [vmem:[%s3106_s10 + $0x8] sm:$0xff] }
 0x204   : > { %v1135_v51 = vmax.f32 %v813_v43, 0.0  ;;  %v1137_v52 = vmax.f32 %v1006_v44, 0.0  ;;  %v1898_v44 = vld [vmem:[%s3118_s3] sm:$0xff] }
 0x205   : > { %v1202_v53 = vpack.c.bf16 %v1134_v47, %v1130_v45  ;;  %v1204_v54 = vpack.c.bf16 %v1136_v48, %v1132_v46 }
 0x206   : > { %v1203_v55 = vpack.c.bf16 %v1135_v51, %v1131_v49  ;;  %v1205_v56 = vpack.c.bf16 %v1137_v52, %v1133_v50  ;;  %v816_v60 = vpop.f32.mrb[60].mxu0  ;;  %v1009_v61 = vpop.f32.mrb[60].mxu1 }
 0x207   : > { %v817_v62 = vadd.f32 %v816_v60, %v3191_v57  ;;  %v1010_v63 = vadd.f32 %v1009_v61, %v3193_v58  ;;  %v818_v1 = vpop.f32.mrb[61].mxu0  ;;  %v1011_v2 = vpop.f32.mrb[61].mxu1 }
 0x208   : > { %v819_v3 = vadd.f32 %v818_v1, %v3195_v0  ;;  %v1012_v4 = vadd.f32 %v1011_v2, %v3197_v59  ;;  %v820_v5 = vpop.f32.mrb[62].mxu0  ;;  %v1013_v6 = vpop.f32.mrb[62].mxu1  ;;  %1610 = vmatprep.mubr.bf16.mxu0 %v1203_v55  ;;  %1771 = vmatprep.mubr.bf16.mxu1 %v1205_v56  ;;  %v2601_v2 = vld [vmem:[%s3106_s10 + $0x10] sm:$0xff] }
 0x209   : > { %v821_v7 = vadd.f32 %v820_v5, %v3191_v57  ;;  %v1014_v8 = vadd.f32 %v1013_v6, %v3193_v58  ;;  %v822_v9 = vpop.f32.mrb[63].mxu0  ;;  %v1015_v10 = vpop.f32.mrb[63].mxu1  ;;  %1611 = vmatmul.mubr.bf16.gmra.mrb[120].mxu0 %v1202_v53  ;;  %1772 = vmatmul.mubr.bf16.gmra.mrb[120].mxu1 %v1204_v54  ;;  %v1138_v13 = vmax.f32 %v817_v62, 0.0  ;;  %v1140_v14 = vmax.f32 %v1010_v63, 0.0  ;;  %v1899_v53 = vld [vmem:[%s3118_s3 + $0x8] sm:$0xff] }
 0x20a   : > { %v823_v11 = vadd.f32 %v822_v9, %v3195_v0  ;;  %v1016_v12 = vadd.f32 %v1015_v10, %v3197_v59  ;;  %v1139_v17 = vmax.f32 %v819_v3, 0.0  ;;  %v1141_v18 = vmax.f32 %v1012_v4, 0.0  ;;  %v2602_v9 = vld [vmem:[%s3106_s10 + $0x18] sm:$0xff] }
 0x20b   : > { %v1142_v15 = vmax.f32 %v821_v7, 0.0  ;;  %v1144_v16 = vmax.f32 %v1014_v8, 0.0  ;;  %v1900_v8 = vld [vmem:[%s3118_s3 + $0x10] sm:$0xff] }
 0x20c   : > { %v1143_v19 = vmax.f32 %v823_v11, 0.0  ;;  %v1145_v20 = vmax.f32 %v1016_v12, 0.0 }
 0x20d   : > { %v1206_v21 = vpack.c.bf16 %v1142_v15, %v1138_v13  ;;  %v1208_v57 = vpack.c.bf16 %v1144_v16, %v1140_v14 }
 0x20e   : > { %v1207_v22 = vpack.c.bf16 %v1143_v19, %v1139_v17  ;;  %v1209_v58 = vpack.c.bf16 %v1145_v20, %v1141_v18 }
 0x210   : > { %1618 = vmatprep.mubr.bf16.mxu0 %v1207_v22  ;;  %1779 = vmatprep.mubr.bf16.mxu1 %v1209_v58 }
 0x211   : > { %1619 = vmatmul.mubr.bf16.gmra.mrb[124].mxu0 %v1206_v21  ;;  %1780 = vmatmul.mubr.bf16.gmra.mrb[124].mxu1 %v1208_v57  ;;  %v1901_v57 = vld [vmem:[%s3118_s3 + $0x18] sm:$0xff] }
 0x26c   : > { %v2230_v0 = vpop.f32.mrb[64].mxu0  ;;  %v2342_v23 = vpop.f32.mrb[64].mxu1 }
 0x26d   : > { %v2231_v59 = vpop.f32.mrb[65].mxu0  ;;  %v2343_v24 = vpop.f32.mrb[65].mxu1 }
 0x26e   : > { %v2232_v25 = vadd.f32 %v2231_v59, %v2230_v0  ;;  %v2344_v26 = vadd.f32 %v2343_v24, %v2342_v23  ;;  %v2233_v27 = vpop.f32.mrb[66].mxu0  ;;  %v2345_v28 = vpop.f32.mrb[66].mxu1  ;;  %v2603_v59 = vld [vmem:[%s3106_s10 + $0x20] sm:$0xff] }
 0x26f   : > { %v2234_v29 = vpop.f32.mrb[67].mxu0  ;;  %v2346_v30 = vpop.f32.mrb[67].mxu1 }
 0x270   : > { %v1662_v31 = vadd.f32 %v2344_v26, %v2232_v25  ;;  %v2235_v32 = vadd.f32 %v2234_v29, %v2233_v27  ;;  %v2347_v33 = vadd.f32 %v2346_v30, %v2345_v28  ;;  %v2604_v28 = vld [vmem:[%s3106_s10 + $0x28] sm:$0xff] }
 0x272   : > { %v1788_v36 = vadd.f32 %v2599_v35, %v1662_v31  ;;  %v1665_v37 = vadd.f32 %v2347_v33, %v2235_v32  ;;  %v1902_v32 = vld [vmem:[%s3118_s3 + $0x20] sm:$0xff] }
 0x274   : > { %v1827_v39 = vmul.f32 %v3330_v34, %v1788_v36  ;;  %v1789_v41 = vadd.f32 %v2600_v40, %v1665_v37  ;;  %v2236_v42 = vpop.f32.mrb[68].mxu0  ;;  %v2348_v43 = vpop.f32.mrb[68].mxu1 }
 0x275   : > { %v2237_v45 = vpop.f32.mrb[69].mxu0  ;;  %v2349_v46 = vpop.f32.mrb[69].mxu1 }
 0x276   : > { %v1866_v47 = vadd.f32 %v3336_v38, %v1827_v39  ;;  %v1828_v48 = vmul.f32 %v3330_v34, %v1789_v41  ;;  %v2238_v49 = vadd.f32 %v2237_v45, %v2236_v42  ;;  %v2350_v50 = vadd.f32 %v2349_v46, %v2348_v43  ;;  %v2239_v51 = vpop.f32.mrb[70].mxu0  ;;  %v2351_v52 = vpop.f32.mrb[70].mxu1  ;;  %v1903_v43 = vld [vmem:[%s3118_s3 + $0x28] sm:$0xff] }
 0x277   : > { %v2240_v54 = vpop.f32.mrb[71].mxu0  ;;  %v2352_v55 = vpop.f32.mrb[71].mxu1 }
 0x278   : > { %v1930_v56 = vadd.f32 %v1898_v44, %v1866_v47  ;;  %v1867_v60 = vadd.f32 %v3336_v38, %v1828_v48  ;;  %v1670_v61 = vadd.f32 %v2350_v50, %v2238_v49  ;;  %v2241_v62 = vadd.f32 %v2240_v54, %v2239_v51 }
 0x279   : > { %v2353_v63 = vadd.f32 %v2352_v55, %v2351_v52  ;;  %v2605_v52 = vld [vmem:[%s3106_s10 + $0x30] sm:$0xff] }
 0x27a   : > { %1962 = vst [vmem:[%s3346_s19] sm:$0xff] %v1930_v56  ;;  %v1931_v1 = vadd.f32 %v1899_v53, %v1867_v60  ;;  %v1790_v3 = vadd.f32 %v2601_v2, %v1670_v61  ;;  %v1904_v61 = vld [vmem:[%s3118_s3 + $0x30] sm:$0xff] }
 0x27b   : > { %v1673_v4 = vadd.f32 %v2353_v63, %v2241_v62  ;;  %v2606_v62 = vld [vmem:[%s3106_s10 + $0x38] sm:$0xff] }
 0x27c   : > { %1963 = vst [vmem:[%s3346_s19 + $0x8] sm:$0xff] %v1931_v1  ;;  %v1829_v5 = vmul.f32 %v3330_v34, %v1790_v3  ;;  %v2242_v6 = vpop.f32.mrb[72].mxu0  ;;  %v2354_v7 = vpop.f32.mrb[72].mxu1 }
 0x27d   : > { %v1791_v10 = vadd.f32 %v2602_v9, %v1673_v4  ;;  %v2243_v11 = vpop.f32.mrb[73].mxu0  ;;  %v2355_v12 = vpop.f32.mrb[73].mxu1 }
 0x27e   : > { %v1868_v13 = vadd.f32 %v3336_v38, %v1829_v5  ;;  %v2244_v14 = vadd.f32 %v2243_v11, %v2242_v6  ;;  %v2356_v15 = vadd.f32 %v2355_v12, %v2354_v7  ;;  %v2245_v16 = vpop.f32.mrb[74].mxu0  ;;  %v2357_v17 = vpop.f32.mrb[74].mxu1  ;;  %v1905_v12 = vld [vmem:[%s3118_s3 + $0x38] sm:$0xff] }
 0x27f   : > { %v1830_v18 = vmul.f32 %v3330_v34, %v1791_v10  ;;  %v2246_v19 = vpop.f32.mrb[75].mxu0  ;;  %v2358_v20 = vpop.f32.mrb[75].mxu1 }
 0x280   : > { %v1932_v21 = vadd.f32 %v1900_v8, %v1868_v13  ;;  %v1678_v22 = vadd.f32 %v2356_v15, %v2244_v14  ;;  %v2247_v58 = vadd.f32 %v2246_v19, %v2245_v16  ;;  %v2359_v0 = vadd.f32 %v2358_v20, %v2357_v17  ;;  %v2607_v17 = vld [vmem:[%s3106_s10 + $0x40] sm:$0xff] }
 0x281   : > { %v1869_v23 = vadd.f32 %v3336_v38, %v1830_v18 }
 0x282   : > { %1964 = vst [vmem:[%s3346_s19 + $0x10] sm:$0xff] %v1932_v21  ;;  %v1792_v24 = vadd.f32 %v2603_v59, %v1678_v22  ;;  %v1681_v25 = vadd.f32 %v2359_v0, %v2247_v58 }
 0x283   : > { %v1933_v26 = vadd.f32 %v1901_v57, %v1869_v23  ;;  %v2608_v57 = vld [vmem:[%s3106_s10 + $0x48] sm:$0xff]  ;;  %v1906_v23 = vld [vmem:[%s3118_s3 + $0x40] sm:$0xff] }
 0x284   : > { %v1831_v27 = vmul.f32 %v3330_v34, %v1792_v24  ;;  %v1793_v29 = vadd.f32 %v2604_v28, %v1681_v25  ;;  %v2248_v30 = vpop.f32.mrb[76].mxu0  ;;  %v2360_v31 = vpop.f32.mrb[76].mxu1 }
 0x285   : > { %1965 = vst [vmem:[%s3346_s19 + $0x18] sm:$0xff] %v1933_v26  ;;  %v2249_v33 = vpop.f32.mrb[77].mxu0  ;;  %v2361_v35 = vpop.f32.mrb[77].mxu1 }
 0x286   : > { %v1870_v36 = vadd.f32 %v3336_v38, %v1831_v27  ;;  %v1832_v37 = vmul.f32 %v3330_v34, %v1793_v29  ;;  %v2250_v39 = vadd.f32 %v2249_v33, %v2248_v30  ;;  %v2362_v40 = vadd.f32 %v2361_v35, %v2360_v31  ;;  %v2251_v41 = vpop.f32.mrb[78].mxu0  ;;  %v2363_v42 = vpop.f32.mrb[78].mxu1  ;;  %v1907_v31 = vld [vmem:[%s3118_s3 + $0x48] sm:$0xff] }
 0x287   : > { %v2252_v44 = vpop.f32.mrb[79].mxu0  ;;  %v2364_v45 = vpop.f32.mrb[79].mxu1 }
 0x288   : > { %v1934_v46 = vadd.f32 %v1902_v32, %v1870_v36  ;;  %v1871_v47 = vadd.f32 %v3336_v38, %v1832_v37  ;;  %v1686_v48 = vadd.f32 %v2362_v40, %v2250_v39  ;;  %v2253_v49 = vadd.f32 %v2252_v44, %v2251_v41 }
 0x289   : > { %v2365_v50 = vadd.f32 %v2364_v45, %v2363_v42  ;;  %v2609_v42 = vld [vmem:[%s3106_s10 + $0x50] sm:$0xff] }
 0x28a   : > { %1966 = vst [vmem:[%s3346_s19 + $0x20] sm:$0xff] %v1934_v46  ;;  %v1935_v51 = vadd.f32 %v1903_v43, %v1871_v47  ;;  %v1794_v53 = vadd.f32 %v2605_v52, %v1686_v48  ;;  %v1908_v48 = vld [vmem:[%s3118_s3 + $0x50] sm:$0xff] }
 0x28b   : > { %v1689_v54 = vadd.f32 %v2365_v50, %v2253_v49  ;;  %v2610_v49 = vld [vmem:[%s3106_s10 + $0x58] sm:$0xff] }
 0x28c   : > { %1967 = vst [vmem:[%s3346_s19 + $0x28] sm:$0xff] %v1935_v51  ;;  %v1833_v55 = vmul.f32 %v3330_v34, %v1794_v53  ;;  %v2254_v56 = vpop.f32.mrb[80].mxu0  ;;  %v2366_v60 = vpop.f32.mrb[80].mxu1 }
 0x28d   : > { %v1795_v63 = vadd.f32 %v2606_v62, %v1689_v54  ;;  %v2255_v1 = vpop.f32.mrb[81].mxu0  ;;  %v2367_v2 = vpop.f32.mrb[81].mxu1 }
 0x28e   : > { %v1872_v3 = vadd.f32 %v3336_v38, %v1833_v55  ;;  %v2256_v4 = vadd.f32 %v2255_v1, %v2254_v56  ;;  %v2368_v5 = vadd.f32 %v2367_v2, %v2366_v60  ;;  %v2257_v6 = vpop.f32.mrb[82].mxu0  ;;  %v2369_v7 = vpop.f32.mrb[82].mxu1  ;;  %v1909_v2 = vld [vmem:[%s3118_s3 + $0x58] sm:$0xff] }
 0x28f   : > { %v1834_v8 = vmul.f32 %v3330_v34, %v1795_v63  ;;  %v2258_v9 = vpop.f32.mrb[83].mxu0  ;;  %v2370_v10 = vpop.f32.mrb[83].mxu1 }
 0x290   : > { %v1936_v11 = vadd.f32 %v1904_v61, %v1872_v3  ;;  %v1694_v13 = vadd.f32 %v2368_v5, %v2256_v4  ;;  %v2259_v14 = vadd.f32 %v2258_v9, %v2257_v6  ;;  %v2371_v15 = vadd.f32 %v2370_v10, %v2369_v7  ;;  %v2611_v7 = vld [vmem:[%s3106_s10 + $0x60] sm:$0xff] }
 0x291   : > { %v1873_v16 = vadd.f32 %v3336_v38, %v1834_v8 }
 0x292   : > { %1968 = vst [vmem:[%s3346_s19 + $0x30] sm:$0xff] %v1936_v11  ;;  %v1796_v18 = vadd.f32 %v2607_v17, %v1694_v13  ;;  %v1697_v19 = vadd.f32 %v2371_v15, %v2259_v14 }
 0x293   : > { %v1937_v20 = vadd.f32 %v1905_v12, %v1873_v16  ;;  %v2612_v12 = vld [vmem:[%s3106_s10 + $0x68] sm:$0xff]  ;;  %v1910_v16 = vld [vmem:[%s3118_s3 + $0x60] sm:$0xff] }
 0x294   : > { %v1835_v21 = vmul.f32 %v3330_v34, %v1796_v18  ;;  %v1797_v22 = vadd.f32 %v2608_v57, %v1697_v19  ;;  %v2260_v58 = vpop.f32.mrb[84].mxu0  ;;  %v2372_v0 = vpop.f32.mrb[84].mxu1 }
 0x295   : > { %1969 = vst [vmem:[%s3346_s19 + $0x38] sm:$0xff] %v1937_v20  ;;  %v2261_v59 = vpop.f32.mrb[85].mxu0  ;;  %v2373_v24 = vpop.f32.mrb[85].mxu1 }
 0x296   : > { %v1874_v25 = vadd.f32 %v3336_v38, %v1835_v21  ;;  %v1836_v26 = vmul.f32 %v3330_v34, %v1797_v22  ;;  %v2262_v27 = vadd.f32 %v2261_v59, %v2260_v58  ;;  %v2374_v28 = vadd.f32 %v2373_v24, %v2372_v0  ;;  %v2263_v29 = vpop.f32.mrb[86].mxu0  ;;  %v2375_v30 = vpop.f32.mrb[86].mxu1  ;;  %v1911_v0 = vld [vmem:[%s3118_s3 + $0x68] sm:$0xff] }
 0x297   : > { %v2264_v32 = vpop.f32.mrb[87].mxu0  ;;  %v2376_v33 = vpop.f32.mrb[87].mxu1 }
 0x298   : > { %v1938_v35 = vadd.f32 %v1906_v23, %v1874_v25  ;;  %v1875_v36 = vadd.f32 %v3336_v38, %v1836_v26  ;;  %v1702_v37 = vadd.f32 %v2374_v28, %v2262_v27  ;;  %v2265_v39 = vadd.f32 %v2264_v32, %v2263_v29 }
 0x299   : > { %v2377_v40 = vadd.f32 %v2376_v33, %v2375_v30  ;;  %v2613_v30 = vld [vmem:[%s3106_s10 + $0x70] sm:$0xff] }
 0x29a   : > { %1970 = vst [vmem:[%s3346_s19 + $0x40] sm:$0xff] %v1938_v35  ;;  %v1939_v41 = vadd.f32 %v1907_v31, %v1875_v36  ;;  %v1798_v43 = vadd.f32 %v2609_v42, %v1702_v37  ;;  %v1912_v37 = vld [vmem:[%s3118_s3 + $0x70] sm:$0xff] }
 0x29b   : > { %v1705_v44 = vadd.f32 %v2377_v40, %v2265_v39  ;;  %v2614_v39 = vld [vmem:[%s3106_s10 + $0x78] sm:$0xff] }
 0x29c   : > { %1971 = vst [vmem:[%s3346_s19 + $0x48] sm:$0xff] %v1939_v41  ;;  %v1837_v45 = vmul.f32 %v3330_v34, %v1798_v43  ;;  %v2266_v46 = vpop.f32.mrb[88].mxu0  ;;  %v2378_v47 = vpop.f32.mrb[88].mxu1 }
 0x29d   : > { %v1799_v50 = vadd.f32 %v2610_v49, %v1705_v44  ;;  %v2267_v51 = vpop.f32.mrb[89].mxu0  ;;  %v2379_v52 = vpop.f32.mrb[89].mxu1 }
 0x29e   : > { %v1876_v53 = vadd.f32 %v3336_v38, %v1837_v45  ;;  %v2268_v54 = vadd.f32 %v2267_v51, %v2266_v46  ;;  %v2380_v55 = vadd.f32 %v2379_v52, %v2378_v47  ;;  %v2269_v56 = vpop.f32.mrb[90].mxu0  ;;  %v2381_v60 = vpop.f32.mrb[90].mxu1  ;;  %v1913_v52 = vld [vmem:[%s3118_s3 + $0x78] sm:$0xff] }
 0x29f   : > { %v1838_v61 = vmul.f32 %v3330_v34, %v1799_v50  ;;  %v2270_v62 = vpop.f32.mrb[91].mxu0  ;;  %v2382_v63 = vpop.f32.mrb[91].mxu1 }
 0x2a0   : > { %v1940_v1 = vadd.f32 %v1908_v48, %v1876_v53  ;;  %v1710_v3 = vadd.f32 %v2380_v55, %v2268_v54  ;;  %v2271_v4 = vadd.f32 %v2270_v62, %v2269_v56  ;;  %v2383_v5 = vadd.f32 %v2382_v63, %v2381_v60  ;;  %v2615_v60 = vld [vmem:[%s3106_s10 + $0x80] sm:$0xff] }
 0x2a1   : > { %v1877_v6 = vadd.f32 %v3336_v38, %v1838_v61 }
 0x2a2   : > { %1972 = vst [vmem:[%s3346_s19 + $0x50] sm:$0xff] %v1940_v1  ;;  %v1800_v8 = vadd.f32 %v2611_v7, %v1710_v3  ;;  %v1713_v9 = vadd.f32 %v2383_v5, %v2271_v4 }
 0x2a3   : > { %v1941_v10 = vadd.f32 %v1909_v2, %v1877_v6  ;;  %v2616_v2 = vld [vmem:[%s3106_s10 + $0x88] sm:$0xff]  ;;  %v1914_v6 = vld [vmem:[%s3118_s3 + $0x80] sm:$0xff] }
 0x2a4   : > { %v1839_v11 = vmul.f32 %v3330_v34, %v1800_v8  ;;  %v1801_v13 = vadd.f32 %v2612_v12, %v1713_v9  ;;  %v2272_v14 = vpop.f32.mrb[92].mxu0  ;;  %v2384_v15 = vpop.f32.mrb[92].mxu1 }
 0x2a5   : > { %1973 = vst [vmem:[%s3346_s19 + $0x58] sm:$0xff] %v1941_v10  ;;  %v2273_v17 = vpop.f32.mrb[93].mxu0  ;;  %v2385_v18 = vpop.f32.mrb[93].mxu1 }
 0x2a6   : > { %v1878_v19 = vadd.f32 %v3336_v38, %v1839_v11  ;;  %v1840_v20 = vmul.f32 %v3330_v34, %v1801_v13  ;;  %v2274_v21 = vadd.f32 %v2273_v17, %v2272_v14  ;;  %v2386_v57 = vadd.f32 %v2385_v18, %v2384_v15  ;;  %v2275_v22 = vpop.f32.mrb[94].mxu0  ;;  %v2387_v58 = vpop.f32.mrb[94].mxu1  ;;  %v1915_v15 = vld [vmem:[%s3118_s3 + $0x88] sm:$0xff] }
 0x2a7   : > { %v2276_v23 = vpop.f32.mrb[95].mxu0  ;;  %v2388_v59 = vpop.f32.mrb[95].mxu1 }
 0x2a8   : > { %v1942_v24 = vadd.f32 %v1910_v16, %v1878_v19  ;;  %v1879_v25 = vadd.f32 %v3336_v38, %v1840_v20  ;;  %v1718_v26 = vadd.f32 %v2386_v57, %v2274_v21  ;;  %v2277_v27 = vadd.f32 %v2276_v23, %v2275_v22 }
 0x2a9   : > { %v2389_v28 = vadd.f32 %v2388_v59, %v2387_v58  ;;  %v2617_v58 = vld [vmem:[%s3106_s10 + $0x90] sm:$0xff] }
 0x2aa   : > { %1974 = vst [vmem:[%s3346_s19 + $0x60] sm:$0xff] %v1942_v24  ;;  %v1943_v29 = vadd.f32 %v1911_v0, %v1879_v25  ;;  %v1802_v31 = vadd.f32 %v2613_v30, %v1718_v26  ;;  %v1916_v26 = vld [vmem:[%s3118_s3 + $0x90] sm:$0xff] }
 0x2ab   : > { %v1721_v32 = vadd.f32 %v2389_v28, %v2277_v27  ;;  %v2618_v27 = vld [vmem:[%s3106_s10 + $0x98] sm:$0xff] }
 0x2ac   : > { %1975 = vst [vmem:[%s3346_s19 + $0x68] sm:$0xff] %v1943_v29  ;;  %v1841_v33 = vmul.f32 %v3330_v34, %v1802_v31  ;;  %v2278_v35 = vpop.f32.mrb[96].mxu0  ;;  %v2390_v36 = vpop.f32.mrb[96].mxu1 }
 0x2ad   : > { %v1803_v40 = vadd.f32 %v2614_v39, %v1721_v32  ;;  %v2279_v41 = vpop.f32.mrb[97].mxu0  ;;  %v2391_v42 = vpop.f32.mrb[97].mxu1 }
 0x2ae   : > { %v1880_v43 = vadd.f32 %v3336_v38, %v1841_v33  ;;  %v2280_v44 = vadd.f32 %v2279_v41, %v2278_v35  ;;  %v2392_v45 = vadd.f32 %v2391_v42, %v2390_v36  ;;  %v2281_v46 = vpop.f32.mrb[98].mxu0  ;;  %v2393_v47 = vpop.f32.mrb[98].mxu1  ;;  %v1917_v42 = vld [vmem:[%s3118_s3 + $0x98] sm:$0xff] }
 0x2af   : > { %v1842_v48 = vmul.f32 %v3330_v34, %v1803_v40  ;;  %v2282_v49 = vpop.f32.mrb[99].mxu0  ;;  %v2394_v50 = vpop.f32.mrb[99].mxu1 }
 0x2b0   : > { %v1944_v51 = vadd.f32 %v1912_v37, %v1880_v43  ;;  %v1726_v53 = vadd.f32 %v2392_v45, %v2280_v44  ;;  %v2283_v54 = vadd.f32 %v2282_v49, %v2281_v46  ;;  %v2395_v55 = vadd.f32 %v2394_v50, %v2393_v47  ;;  %v2619_v47 = vld [vmem:[%s3106_s10 + $0xa0] sm:$0xff] }
 0x2b1   : > { %v1881_v56 = vadd.f32 %v3336_v38, %v1842_v48 }
 0x2b2   : > { %1976 = vst [vmem:[%s3346_s19 + $0x70] sm:$0xff] %v1944_v51  ;;  %v1804_v61 = vadd.f32 %v2615_v60, %v1726_v53  ;;  %v1729_v62 = vadd.f32 %v2395_v55, %v2283_v54 }
 0x2b3   : > { %v1945_v63 = vadd.f32 %v1913_v52, %v1881_v56  ;;  %v2620_v52 = vld [vmem:[%s3106_s10 + $0xa8] sm:$0xff]  ;;  %v1918_v56 = vld [vmem:[%s3118_s3 + $0xa0] sm:$0xff] }
 0x2b4   : > { %v1843_v1 = vmul.f32 %v3330_v34, %v1804_v61  ;;  %v1805_v3 = vadd.f32 %v2616_v2, %v1729_v62  ;;  %v2284_v4 = vpop.f32.mrb[100].mxu0  ;;  %v2396_v5 = vpop.f32.mrb[100].mxu1 }
 0x2b5   : > { %1977 = vst [vmem:[%s3346_s19 + $0x78] sm:$0xff] %v1945_v63  ;;  %v2285_v7 = vpop.f32.mrb[101].mxu0  ;;  %v2397_v8 = vpop.f32.mrb[101].mxu1 }
 0x2b6   : > { %v1882_v9 = vadd.f32 %v3336_v38, %v1843_v1  ;;  %v1844_v10 = vmul.f32 %v3330_v34, %v1805_v3  ;;  %v2286_v11 = vadd.f32 %v2285_v7, %v2284_v4  ;;  %v2398_v12 = vadd.f32 %v2397_v8, %v2396_v5  ;;  %v2287_v13 = vpop.f32.mrb[102].mxu0  ;;  %v2399_v14 = vpop.f32.mrb[102].mxu1  ;;  %v1919_v5 = vld [vmem:[%s3118_s3 + $0xa8] sm:$0xff] }
 0x2b7   : > { %v2288_v16 = vpop.f32.mrb[103].mxu0  ;;  %v2400_v17 = vpop.f32.mrb[103].mxu1 }
 0x2b8   : > { %v1946_v18 = vadd.f32 %v1914_v6, %v1882_v9  ;;  %v1883_v19 = vadd.f32 %v3336_v38, %v1844_v10  ;;  %v1734_v20 = vadd.f32 %v2398_v12, %v2286_v11  ;;  %v2289_v21 = vadd.f32 %v2288_v16, %v2287_v13 }
 0x2b9   : > { %v2401_v57 = vadd.f32 %v2400_v17, %v2399_v14  ;;  %v2621_v14 = vld [vmem:[%s3106_s10 + $0xb0] sm:$0xff] }
 0x2ba   : > { %1978 = vst [vmem:[%s3346_s19 + $0x80] sm:$0xff] %v1946_v18  ;;  %v1947_v22 = vadd.f32 %v1915_v15, %v1883_v19  ;;  %v1806_v0 = vadd.f32 %v2617_v58, %v1734_v20  ;;  %v1920_v20 = vld [vmem:[%s3118_s3 + $0xb0] sm:$0xff] }
 0x2bb   : > { %v1737_v23 = vadd.f32 %v2401_v57, %v2289_v21  ;;  %v2622_v21 = vld [vmem:[%s3106_s10 + $0xb8] sm:$0xff] }
 0x2bc   : > { %1979 = vst [vmem:[%s3346_s19 + $0x88] sm:$0xff] %v1947_v22  ;;  %v1845_v59 = vmul.f32 %v3330_v34, %v1806_v0  ;;  %v2290_v24 = vpop.f32.mrb[104].mxu0  ;;  %v2402_v25 = vpop.f32.mrb[104].mxu1 }
 0x2bd   : > { %v1807_v28 = vadd.f32 %v2618_v27, %v1737_v23  ;;  %v2291_v29 = vpop.f32.mrb[105].mxu0  ;;  %v2403_v30 = vpop.f32.mrb[105].mxu1 }
 0x2be   : > { %v1884_v31 = vadd.f32 %v3336_v38, %v1845_v59  ;;  %v2292_v32 = vadd.f32 %v2291_v29, %v2290_v24  ;;  %v2404_v33 = vadd.f32 %v2403_v30, %v2402_v25  ;;  %v2293_v35 = vpop.f32.mrb[106].mxu0  ;;  %v2405_v36 = vpop.f32.mrb[106].mxu1  ;;  %v1921_v30 = vld [vmem:[%s3118_s3 + $0xb8] sm:$0xff] }
 0x2bf   : > { %v1846_v37 = vmul.f32 %v3330_v34, %v1807_v28  ;;  %v2294_v39 = vpop.f32.mrb[107].mxu0  ;;  %v2406_v40 = vpop.f32.mrb[107].mxu1 }
 0x2c0   : > { %v1948_v41 = vadd.f32 %v1916_v26, %v1884_v31  ;;  %v1742_v43 = vadd.f32 %v2404_v33, %v2292_v32  ;;  %v2295_v44 = vadd.f32 %v2294_v39, %v2293_v35  ;;  %v2407_v45 = vadd.f32 %v2406_v40, %v2405_v36  ;;  %v2623_v36 = vld [vmem:[%s3106_s10 + $0xc0] sm:$0xff] }
 0x2c1   : > { %v1885_v46 = vadd.f32 %v3336_v38, %v1846_v37 }
 0x2c2   : > { %1980 = vst [vmem:[%s3346_s19 + $0x90] sm:$0xff] %v1948_v41  ;;  %v1808_v48 = vadd.f32 %v2619_v47, %v1742_v43  ;;  %v1745_v49 = vadd.f32 %v2407_v45, %v2295_v44 }
 0x2c3   : > { %v1949_v50 = vadd.f32 %v1917_v42, %v1885_v46  ;;  %v2624_v42 = vld [vmem:[%s3106_s10 + $0xc8] sm:$0xff]  ;;  %v1922_v46 = vld [vmem:[%s3118_s3 + $0xc0] sm:$0xff] }
 0x2c4   : > { %v1847_v51 = vmul.f32 %v3330_v34, %v1808_v48  ;;  %v1809_v53 = vadd.f32 %v2620_v52, %v1745_v49  ;;  %v2296_v54 = vpop.f32.mrb[108].mxu0  ;;  %v2408_v55 = vpop.f32.mrb[108].mxu1 }
 0x2c5   : > { %1981 = vst [vmem:[%s3346_s19 + $0x98] sm:$0xff] %v1949_v50  ;;  %v2297_v60 = vpop.f32.mrb[109].mxu0  ;;  %v2409_v61 = vpop.f32.mrb[109].mxu1 }
 0x2c6   : > { %v1886_v62 = vadd.f32 %v3336_v38, %v1847_v51  ;;  %v1848_v63 = vmul.f32 %v3330_v34, %v1809_v53  ;;  %v2298_v1 = vadd.f32 %v2297_v60, %v2296_v54  ;;  %v2410_v2 = vadd.f32 %v2409_v61, %v2408_v55  ;;  %v2299_v3 = vpop.f32.mrb[110].mxu0  ;;  %v2411_v4 = vpop.f32.mrb[110].mxu1  ;;  %v1923_v55 = vld [vmem:[%s3118_s3 + $0xc8] sm:$0xff] }
 0x2c7   : > { %v2300_v6 = vpop.f32.mrb[111].mxu0  ;;  %v2412_v7 = vpop.f32.mrb[111].mxu1 }
 0x2c8   : > { %v1950_v8 = vadd.f32 %v1918_v56, %v1886_v62  ;;  %v1887_v9 = vadd.f32 %v3336_v38, %v1848_v63  ;;  %v1750_v10 = vadd.f32 %v2410_v2, %v2298_v1  ;;  %v2301_v11 = vadd.f32 %v2300_v6, %v2299_v3 }
 0x2c9   : > { %v2413_v12 = vadd.f32 %v2412_v7, %v2411_v4  ;;  %v2625_v4 = vld [vmem:[%s3106_s10 + $0xd0] sm:$0xff] }
 0x2ca   : > { %1982 = vst [vmem:[%s3346_s19 + $0xa0] sm:$0xff] %v1950_v8  ;;  %v1951_v13 = vadd.f32 %v1919_v5, %v1887_v9  ;;  %v1810_v15 = vadd.f32 %v2621_v14, %v1750_v10  ;;  %v1924_v10 = vld [vmem:[%s3118_s3 + $0xd0] sm:$0xff] }
 0x2cb   : > { %v1753_v16 = vadd.f32 %v2413_v12, %v2301_v11  ;;  %v2626_v11 = vld [vmem:[%s3106_s10 + $0xd8] sm:$0xff] }
 0x2cc   : > { %1983 = vst [vmem:[%s3346_s19 + $0xa8] sm:$0xff] %v1951_v13  ;;  %v1849_v17 = vmul.f32 %v3330_v34, %v1810_v15  ;;  %v2302_v18 = vpop.f32.mrb[112].mxu0  ;;  %v2414_v19 = vpop.f32.mrb[112].mxu1 }
 0x2cd   : > { %v1811_v57 = vadd.f32 %v2622_v21, %v1753_v16  ;;  %v2303_v22 = vpop.f32.mrb[113].mxu0  ;;  %v2415_v58 = vpop.f32.mrb[113].mxu1 }
 0x2ce   : > { %v1888_v0 = vadd.f32 %v3336_v38, %v1849_v17  ;;  %v2304_v23 = vadd.f32 %v2303_v22, %v2302_v18  ;;  %v2416_v59 = vadd.f32 %v2415_v58, %v2414_v19  ;;  %v2305_v24 = vpop.f32.mrb[114].mxu0  ;;  %v2417_v25 = vpop.f32.mrb[114].mxu1  ;;  %v1925_v58 = vld [vmem:[%s3118_s3 + $0xd8] sm:$0xff] }
 0x2cf   : > { %v1850_v26 = vmul.f32 %v3330_v34, %v1811_v57  ;;  %v2306_v27 = vpop.f32.mrb[115].mxu0  ;;  %v2418_v28 = vpop.f32.mrb[115].mxu1 }
 0x2d0   : > { %v1952_v29 = vadd.f32 %v1920_v20, %v1888_v0  ;;  %v1758_v31 = vadd.f32 %v2416_v59, %v2304_v23  ;;  %v2307_v32 = vadd.f32 %v2306_v27, %v2305_v24  ;;  %v2419_v33 = vadd.f32 %v2418_v28, %v2417_v25  ;;  %v2627_v25 = vld [vmem:[%s3106_s10 + $0xe0] sm:$0xff] }
 0x2d1   : > { %v1889_v35 = vadd.f32 %v3336_v38, %v1850_v26 }
 0x2d2   : > { %1984 = vst [vmem:[%s3346_s19 + $0xb0] sm:$0xff] %v1952_v29  ;;  %v1812_v37 = vadd.f32 %v2623_v36, %v1758_v31  ;;  %v1761_v39 = vadd.f32 %v2419_v33, %v2307_v32 }
 0x2d3   : > { %v1953_v40 = vadd.f32 %v1921_v30, %v1889_v35  ;;  %v2628_v30 = vld [vmem:[%s3106_s10 + $0xe8] sm:$0xff]  ;;  %v1926_v35 = vld [vmem:[%s3118_s3 + $0xe0] sm:$0xff] }
 0x2d4   : > { %v1851_v41 = vmul.f32 %v3330_v34, %v1812_v37  ;;  %v1813_v43 = vadd.f32 %v2624_v42, %v1761_v39  ;;  %v2308_v44 = vpop.f32.mrb[116].mxu0  ;;  %v2420_v45 = vpop.f32.mrb[116].mxu1 }
 0x2d5   : > { %1985 = vst [vmem:[%s3346_s19 + $0xb8] sm:$0xff] %v1953_v40  ;;  %v2309_v47 = vpop.f32.mrb[117].mxu0  ;;  %v2421_v48 = vpop.f32.mrb[117].mxu1 }
 0x2d6   : > { %v1890_v49 = vadd.f32 %v3336_v38, %v1851_v41  ;;  %v1852_v50 = vmul.f32 %v3330_v34, %v1813_v43  ;;  %v2310_v51 = vadd.f32 %v2309_v47, %v2308_v44  ;;  %v2422_v52 = vadd.f32 %v2421_v48, %v2420_v45  ;;  %v2311_v53 = vpop.f32.mrb[118].mxu0  ;;  %v2423_v54 = vpop.f32.mrb[118].mxu1  ;;  %v1927_v45 = vld [vmem:[%s3118_s3 + $0xe8] sm:$0xff] }
 0x2d7   : > { %v2312_v56 = vpop.f32.mrb[119].mxu0  ;;  %v2424_v60 = vpop.f32.mrb[119].mxu1 }
 0x2d8   : > { %v1954_v61 = vadd.f32 %v1922_v46, %v1890_v49  ;;  %v1891_v62 = vadd.f32 %v3336_v38, %v1852_v50  ;;  %v1766_v63 = vadd.f32 %v2422_v52, %v2310_v51  ;;  %v2313_v1 = vadd.f32 %v2312_v56, %v2311_v53 }
 0x2d9   : > { %v2425_v2 = vadd.f32 %v2424_v60, %v2423_v54  ;;  %v2629_v54 = vld [vmem:[%s3106_s10 + $0xf0] sm:$0xff] }
 0x2da   : > { %1986 = vst [vmem:[%s3346_s19 + $0xc0] sm:$0xff] %v1954_v61  ;;  %v1955_v3 = vadd.f32 %v1923_v55, %v1891_v62  ;;  %v1814_v5 = vadd.f32 %v2625_v4, %v1766_v63  ;;  %v1928_v61 = vld [vmem:[%s3118_s3 + $0xf0] sm:$0xff]  ;;  %v2630_v62 = vld [vmem:[%s3106_s10 + $0xf8] sm:$0xff]  ;;  %s2751_s10 = sshll.u32 %s2834_s29, 4  ;;  %s2752_s10 = int_to_ptr.vmem [resolvable:$false] %s2751_s10 }
 0x2db   : > { %v1769_v6 = vadd.f32 %v2425_v2, %v2313_v1  ;;  %v1929_v4 = vld [vmem:[%s3118_s3 + $0xf8] sm:$0xff]  ;;  %s2753_s1 = scalar_lea.vmem %s2752_s10, 8192  ;;  %p2754_p6 = scmp.lt.s32.totalorder %s3506_s0, %s2752_s10 }
 0x2dc   : > { %1987 = vst [vmem:[%s3346_s19 + $0xc8] sm:$0xff] %v1955_v3  ;;  %v1853_v7 = vmul.f32 %v3330_v34, %v1814_v5  ;;  %v2314_v8 = vpop.f32.mrb[120].mxu0  ;;  %v2426_v9 = vpop.f32.mrb[120].mxu1  ;;  %p2755_p10 = scmp.lt.s32.totalorder %s2753_s1, %s2747_s28 }
 0x2dd   : > { %v1815_v12 = vadd.f32 %v2626_v11, %v1769_v6  ;;  %v2315_v13 = vpop.f32.mrb[121].mxu0  ;;  %v2427_v14 = vpop.f32.mrb[121].mxu1 }
 0x2de   : > { %v1892_v15 = vadd.f32 %v3336_v38, %v1853_v7  ;;  %v2316_v16 = vadd.f32 %v2315_v13, %v2314_v8  ;;  %v2428_v17 = vadd.f32 %v2427_v14, %v2426_v9  ;;  %v2317_v18 = vpop.f32.mrb[122].mxu0  ;;  %v2429_v19 = vpop.f32.mrb[122].mxu1  ;;  %p2756_p4 = por %p2755_p10, %p2754_p6 }
 0x2df   : > { %v1854_v20 = vmul.f32 %v3330_v34, %v1815_v12  ;;  %v2318_v21 = vpop.f32.mrb[123].mxu0  ;;  %v2430_v57 = vpop.f32.mrb[123].mxu1 }
 0x2e0   : > { %v1956_v22 = vadd.f32 %v1924_v10, %v1892_v15  ;;  %v1774_v0 = vadd.f32 %v2428_v17, %v2316_v16  ;;  %v2319_v23 = vadd.f32 %v2318_v21, %v2317_v18  ;;  %v2431_v59 = vadd.f32 %v2430_v57, %v2429_v19  ;;  %p2757_p7 = pnand %p2756_p4, %p2750_p13 }
 0x2e1   : > { %v1893_v24 = vadd.f32 %v3336_v38, %v1854_v20 }
 0x2e2   : > { %1988 = vst [vmem:[%s3346_s19 + $0xd0] sm:$0xff] %v1956_v22  ;;  %v1816_v26 = vadd.f32 %v2627_v25, %v1774_v0  ;;  %v1777_v27 = vadd.f32 %v2431_v59, %v2319_v23 }
 0x2e3   : > { %v1957_v28 = vadd.f32 %v1925_v58, %v1893_v24 }
 0x2e4   : > { %v1855_v29 = vmul.f32 %v3330_v34, %v1816_v26  ;;  %v1817_v31 = vadd.f32 %v2628_v30, %v1777_v27  ;;  %v2320_v32 = vpop.f32.mrb[124].mxu0  ;;  %v2432_v33 = vpop.f32.mrb[124].mxu1 }
 0x2e5   : > { %1989 = vst [vmem:[%s3346_s19 + $0xd8] sm:$0xff] %v1957_v28  ;;  %v2321_v36 = vpop.f32.mrb[125].mxu0  ;;  %v2433_v37 = vpop.f32.mrb[125].mxu1 }
 0x2e6   : > { %v1894_v39 = vadd.f32 %v3336_v38, %v1855_v29  ;;  %v1856_v40 = vmul.f32 %v3330_v34, %v1817_v31  ;;  %v2322_v41 = vadd.f32 %v2321_v36, %v2320_v32  ;;  %v2434_v42 = vadd.f32 %v2433_v37, %v2432_v33  ;;  %v2323_v43 = vpop.f32.mrb[126].mxu0  ;;  %v2435_v44 = vpop.f32.mrb[126].mxu1 }
 0x2e7   : > { %v2324_v46 = vpop.f32.mrb[127].mxu0  ;;  %v2436_v47 = vpop.f32.mrb[127].mxu1 }
 0x2e8   : > { %v1958_v48 = vadd.f32 %v1926_v35, %v1894_v39  ;;  %v1895_v49 = vadd.f32 %v3336_v38, %v1856_v40  ;;  %v1782_v50 = vadd.f32 %v2434_v42, %v2322_v41  ;;  %v2325_v51 = vadd.f32 %v2324_v46, %v2323_v43 }
 0x2e9   : > { %v2437_v52 = vadd.f32 %v2436_v47, %v2435_v44 }
 0x2ea   : > { %1990 = vst [vmem:[%s3346_s19 + $0xe0] sm:$0xff] %v1958_v48  ;;  %v1959_v53 = vadd.f32 %v1927_v45, %v1895_v49  ;;  %v1818_v55 = vadd.f32 %v2629_v54, %v1782_v50 }
 0x2eb   : > { %v1785_v56 = vadd.f32 %v2437_v52, %v2325_v51 }
 0x2ec   : > { %1991 = vst [vmem:[%s3346_s19 + $0xe8] sm:$0xff] %v1959_v53  ;;  %v1857_v60 = vmul.f32 %v3330_v34, %v1818_v55 }
 0x2ed   : > { %v1819_v63 = vadd.f32 %v2630_v62, %v1785_v56 }
 0x2ee   : > { %v1896_v1 = vadd.f32 %v3336_v38, %v1857_v60 }
 0x2ef   : > { %v1858_v2 = vmul.f32 %v3330_v34, %v1819_v63 }
 0x2f0   : > { %v1960_v3 = vadd.f32 %v1928_v61, %v1896_v1 }
 0x2f1   : > { %v1897_v5 = vadd.f32 %v3336_v38, %v1858_v2 }
 0x2f2   : > { %1992 = vst [vmem:[%s3346_s19 + $0xf0] sm:$0xff] %v1960_v3 }
 0x2f3   : > { %v1961_v6 = vadd.f32 %v1929_v4, %v1897_v5 }
 0x2f5   : > { %1993 = vst [vmem:[%s3346_s19 + $0xf8] sm:$0xff] %v1961_v6 }
 0x2f6   : > { %2760 = shalt.err (!%p2757_p7)
}
 0x2f7   : > { %s2761_s3 = scalar_lea.hbm %s3504_s11, 4096  ;;  %s2765_s12 = scalar_lea.hbm %s3558_s7, 8192 }
 0x2f8   : > { %p2762_p3 = scmp.ne.s32.totalorder %s3504_s11, %s2761_s3  ;;  %p2766_p0 = scmp.lt.u32.totalorder %s3504_s11, %s3558_s7 }
 0x2f9   : > { %p2767_p11 = scmp.lt.u32.totalorder %s2765_s12, %s2761_s3  ;;  %p2769_p1 = scmp.lt.u32.totalorder %s2761_s3, %s3504_s11 }
 0x2fa   : > { %p2763_p5 = pnand %p2762_p3, %p3583_p12 }
 0x2fb   : > { %p2768_p8 = por %p2767_p11, %p2766_p0 }
 0x2fc   : > { %p2764_p9 = pneg %p2763_p5 }
 0x2fd   : > { %p2770_p2 = por %p2769_p1, %p2768_p8 }
 0x2ff   : > { %p2771_p13 = pnand %p2770_p2, %p2764_p9 }
 0x301   : > { %2774 = shalt.err (!%p2771_p13)
}
 0x302   : > { %s2835_s20 = smov 128   ;;  %s2836_s19 = smov 8  }
 0x303   : > { %2450 = dma.vmem_to_hbm [thread:$0]  (%p3583_p12), %s3506_s0, 4096, %s3504_s11, %s1995_s23, %s2835_s20, %s2835_s20, %s2836_s19  }
 0x304 PF: > { %s2023_s22 = sand.u32 1, %s2809_s24   ;;  %p3584_p6 = scmp.ne.s32.totalorder %s3568_s8, 0 }
 0x305   : > { %p3585_p10 = scmp.ge.s32.totalorder %s2821_s27, 2  ;;  %s2024_s16 = scalar_lea.sflag [#allocation4], %s2023_s22 }
 0x307   : > { %p2467_p4 = pnand %p3585_p10, %p3584_p6 }
 0x309   : > { %2804 = dma.done.wait (!%p2467_p4), %s2024_s16, 4096  }
 0x30a   : > { %2806 = vsyncadd (!%p2467_p4), %s2024_s16, 4294963200  ;;  %s3586_s14 = sld [smem:[#allocation15_spill]]  ;;  %p24_p7 = scmp.ge.s32.totalorder %s2987_s13, 4  }
 0x30b   : > { %s3587_s24 = smov %s2813_s25  ;;  %s3588_s25 = smov %s2817_s26 }
 0x30c   : > { %s3590_s27 = smov %s2987_s13  ;;  %26 = sbr.rel (!%p24_p7) target bundleno = 12 (0xc), region = 114 }
 0x310   : > { %s3589_s26 = smov %s3586_s14 }
 0x313   :  { %2029 = vsyncpa [#allocation3], 1 }
 0x314   :  { %2031 = vsyncpa [#allocation3 + $0x1], 1 }
 0x315   :  { %2032 = vsyncpa [#allocation6], 1 }
 0x316   :  { %2033 = vsyncpa [#allocation9], 1 }
 0x317   :  { %2035 = vsyncpa [#allocation9 + $0x1], 1 }
 0x318   :  { %2036 = vsyncpa [#allocation4], 1 }
 0x319   :  { %2038 = vsyncpa [#allocation4 + $0x1], 1 }

</bundles_post_ra>
